<compile_context>
chip_gen: v7x
topology: tpu7x:2x2x1
jax: 0.10.0
libtpu: 0.0.40
codegen_flags: <defaults>
</compile_context>

<pallas_src>
import functools

import jax
import jax.numpy as jnp
from jax.experimental import pallas as pl
from jax.experimental.pallas import tpu as pltpu


def _round_up(a: int, b: int) -> int:
    return (a + b - 1) // b * b


def _cdiv(a: int, b: int) -> int:
    return (a + b - 1) // b


def gated_sae_kernel(
    std_ref,        # SMEM (1,)  : standard_norm
    xn_ref,         # (TB, D_IN)   matmul dtype : pre-normalized input
    out_bias_ref,   # (1, D_IN)    f32          : b_dec*std + mean
    w_enc_ref,      # (D_IN, TH)   matmul dtype
    b_enc_ref,      # (1, TH)      f32
    mag_scale_ref,  # (1, TH)      f32 = exp(r_mag), precomputed
    b_gate_ref,     # (1, TH)      f32
    w_dec_ref,      # (TH, D_IN)   matmul dtype
    recons_ref,     # (TB, D_IN)   f32 out; resident accumulator over h
    feats_ref,      # (TB, TH)     out
    pi_gate_ref,    # (TB, TH)     out
):
    h = pl.program_id(1)

    # --- once per batch tile: zero the resident recons accumulator. ---
    @pl.when(h == 0)
    def _():
        recons_ref[...] = jnp.zeros_like(recons_ref)

    # --- encoder matmul (MXU), f32 accumulation. ---
    pre = jnp.dot(xn_ref[...], w_enc_ref[...],
                  preferred_element_type=jnp.float32)

    # --- gated activation (VPU, all f32). ---
    x_mag = jnp.maximum(pre * mag_scale_ref[...] + b_enc_ref[...], 0.0)
    pi_gate = pre + b_gate_ref[...]
    feats = jnp.where(pi_gate > 0.0, x_mag, 0.0)

    # --- decoder matmul (MXU): accumulate into the resident recons block. ---
    recons_ref[...] += jnp.dot(feats.astype(w_dec_ref.dtype), w_dec_ref[...],
                               preferred_element_type=jnp.float32)

    feats_ref[...] = feats.astype(feats_ref.dtype)
    pi_gate_ref[...] = pi_gate.astype(pi_gate_ref.dtype)

    # --- once per batch tile: un-normalize in place and emit recons. ---
    @pl.when(h == pl.num_programs(1) - 1)
    def _():
        recons_ref[...] = recons_ref[...] * std_ref[0] + out_bias_ref[...]


def _vmem_estimate(TB, TH, d_in, wsize, act_size):
    """Double-buffered VMEM footprint of one grid step (bytes)."""
    return (2 * TB * d_in * wsize                    # xn input
            + 2 * d_in * 4                           # out_bias
            + 2 * (d_in * TH + TH * d_in) * wsize    # W_enc, W_dec tiles
            + 2 * 3 * TH * 4                         # b_enc, mag_scale, b_gate
            + 2 * TB * d_in * 4                      # recons out (resident)
            + 2 * 2 * TB * TH * act_size)            # feats, pi_gate out


def gated_sae_forward(x, params, *, tb=None, th=None,
                      matmul_dtype=jnp.bfloat16,
                      activations_dtype=jnp.float32):
    """Gated SAE forward. x: [B, d_input]. Returns (recons, feats, pi_gate).

    matmul_dtype: dtype of the streamed W_enc/W_dec tiles and matmul inputs
      (bf16 default halves weight HBM traffic; accumulation stays f32).
      NOTE: with bf16, recons is computed from bf16-rounded feats while the
      returned feats are cast to `activations_dtype`; they agree to ~1e-2.
    activations_dtype: output dtype for feats / pi_gate (bf16 halves output
      HBM traffic if downstream allows).
    """
    B, d_in = x.shape
    d_hid = params["W_enc"].shape[1]
    f32 = jnp.float32
    wsize = jnp.dtype(matmul_dtype).itemsize
    act_size = jnp.dtype(activations_dtype).itemsize

    # ---------------- device VMEM budget ----------------
    try:
        phys_vmem = int(pltpu.get_tpu_info().vmem_capacity_bytes)
    except Exception:  # non-TPU / interpret fallback
        phys_vmem = 128 * 1024 * 1024
    vmem_budget = int(phys_vmem * 0.70)

    # ---------------- tile sizes ----------------
    B8 = _round_up(max(B, 8), 8)
    H128 = _round_up(d_hid, 128)

    if tb is None:
        tb = 512 if phys_vmem >= 100 * 1024 * 1024 else 256
    if th is None:
        th = 512

    TB = _round_up(min(tb, B8), 8)
    TH = _round_up(min(th, H128), 128)

    # Keep >= 2 batch tiles so the "parallel" axis can shard across both
    # TensorCores on v7x (irrelevant on 1-TC chips, harmless there).
    if B8 >= 256 and _cdiv(B8, TB) < 2:
        TB = _round_up(_cdiv(B8, 2), 8)

    # Shrink tiles until the double-buffered footprint fits the VMEM budget.
    while (_vmem_estimate(TB, TH, d_in, wsize, act_size) > vmem_budget
           and (TB > 8 or TH > 128)):
        if TH > 128 and (TH >= TB or TB <= 8):
            TH = max(128, _round_up(TH // 2, 128))
        else:
            TB = max(8, _round_up(TB // 2, 8))

    B_pad = _round_up(B8, TB)
    H_pad = _round_up(H128, TH)
    grid = (B_pad // TB, H_pad // TH)

    # ---------------- parameter / input prep (hoisted out of the kernel) ----
    mean = jnp.asarray(params["mean"], f32).reshape(1, d_in)
    b_dec = jnp.asarray(params["b_dec"], f32).reshape(1, d_in)
    std = jnp.asarray(params["standard_norm"], f32).reshape(())
    # TODO(synk): if standard_norm ever becomes a per-feature vector, move it
    # from SMEM to a (1, d_in) VMEM input.
    std_smem = std.reshape(1).astype(f32)                       # SMEM scalar
    out_bias = b_dec * std + mean                               # (1, d_in) f32
    w_enc = jnp.asarray(params["W_enc"]).astype(matmul_dtype)
    w_dec = jnp.asarray(params["W_dec"]).astype(matmul_dtype)
    b_enc = jnp.asarray(params["b_enc"], f32).reshape(1, d_hid)
    mag_scale = jnp.exp(jnp.asarray(params["r_mag"], f32)).reshape(1, d_hid)
    b_gate = jnp.asarray(params["b_gate"], f32).reshape(1, d_hid)

    # Normalization hoisted to the wrapper (one cheap pass over x; the kernel
    # streams the already-normalized, already-cast xn).
    x = jnp.asarray(x, f32)
    xn = ((x - mean) / std - b_dec).astype(matmul_dtype)
    if B_pad != B:
        xn = jnp.pad(xn, ((0, B_pad - B), (0, 0)))
    if H_pad != d_hid:
        hp = H_pad - d_hid
        w_enc = jnp.pad(w_enc, ((0, 0), (0, hp)))
        w_dec = jnp.pad(w_dec, ((0, hp), (0, 0)))
        b_enc = jnp.pad(b_enc, ((0, 0), (0, hp)))
        mag_scale = jnp.pad(mag_scale, ((0, 0), (0, hp)))   # pad=0 => gate off
        b_gate = jnp.pad(b_gate, ((0, 0), (0, hp)))

    # ---------------- cost estimate & VMEM limit ----------------
    n_btiles = grid[0]
    flops = 4 * B_pad * d_in * H_pad                       # enc + dec matmuls
    bytes_accessed = (B_pad * d_in * wsize                 # xn in
                      + n_btiles * 2 * d_in * H_pad * wsize  # W re-streamed per batch tile
                      + B_pad * d_in * 4                   # recons out
                      + 2 * B_pad * H_pad * act_size)      # feats + pi_gate out
    cost = pl.CostEstimate(flops=int(flops), transcendentals=0,
                           bytes_accessed=int(bytes_accessed))

    vmem_bytes = _vmem_estimate(TB, TH, d_in, wsize, act_size)
    vmem_limit = max(16 * 1024 * 1024,
                     min(int(vmem_bytes * 1.3) + (2 << 20),
                         int(phys_vmem * 0.9)))

    # ---------------- pallas_call ----------------
    kernel = pl.pallas_call(
        gated_sae_kernel,
        out_shape=[
            jax.ShapeDtypeStruct((B_pad, d_in), f32),               # recons
            jax.ShapeDtypeStruct((B_pad, H_pad), activations_dtype),  # feats
            jax.ShapeDtypeStruct((B_pad, H_pad), activations_dtype),  # pi_gate
        ],
        grid_spec=pltpu.PrefetchScalarGridSpec(
            num_scalar_prefetch=0,
            grid=grid,
            in_specs=[
                pl.BlockSpec(memory_space=pltpu.MemorySpace.SMEM),  # std
                pl.BlockSpec((TB, d_in), lambda i, h: (i, 0)),      # xn
                pl.BlockSpec((1, d_in), lambda i, h: (0, 0)),       # out_bias
                pl.BlockSpec((d_in, TH), lambda i, h: (0, h)),      # W_enc
                pl.BlockSpec((1, TH), lambda i, h: (0, h)),         # b_enc
                pl.BlockSpec((1, TH), lambda i, h: (0, h)),         # exp(r_mag)
                pl.BlockSpec((1, TH), lambda i, h: (0, h)),         # b_gate
                pl.BlockSpec((TH, d_in), lambda i, h: (h, 0)),      # W_dec
            ],
            out_specs=[
                pl.BlockSpec((TB, d_in), lambda i, h: (i, 0)),      # recons (resident over h)
                pl.BlockSpec((TB, TH), lambda i, h: (i, h)),        # feats
                pl.BlockSpec((TB, TH), lambda i, h: (i, h)),        # pi_gate
            ],
        ),
        compiler_params=pltpu.CompilerParams(
            dimension_semantics=("parallel", "arbitrary"),
            vmem_limit_bytes=vmem_limit,
        ),
        cost_estimate=cost,
    )
    recons, feats, pi_gate = kernel(std_smem, xn, out_bias, w_enc, b_enc,
                                    mag_scale, b_gate, w_dec)
    return recons[:B], feats[:B, :d_hid], pi_gate[:B, :d_hid]


def init_params(key, d_input, d_hidden):
    """Deterministic init matching GatedSparseAutoencoder.reset_parameters()."""
    k_enc, k_dec = jax.random.split(key)
    w_enc = jax.random.uniform(k_enc, (d_input, d_hidden), jnp.float32, -1.0, 1.0)
    w_enc = w_enc / jnp.linalg.norm(w_enc, axis=-1, keepdims=True)
    w_dec = jax.random.uniform(k_dec, (d_hidden, d_input), jnp.float32, -1.0, 1.0)
    w_dec = w_dec / jnp.linalg.norm(w_dec, axis=-1, keepdims=True)
    return {
        "W_enc": w_enc,
        "b_enc": jnp.zeros((d_hidden,), jnp.float32),
        "W_dec": w_dec,
        "b_dec": jnp.zeros((d_input,), jnp.float32),
        "mean": jnp.zeros((d_input,), jnp.float32),
        "standard_norm": jnp.ones((), jnp.float32),
        "r_mag": jnp.zeros((d_hidden,), jnp.float32),
        "b_gate": jnp.zeros((d_hidden,), jnp.float32),
    }


def reference_forward(x, p):
    """Pure-JAX reference (mathematically identical to the PyTorch module)."""
    xn = (x - p["mean"]) / p["standard_norm"] - p["b_dec"]
    pre = xn @ p["W_enc"]
    x_mag = jax.nn.relu(pre * jnp.exp(p["r_mag"]) + p["b_enc"])
    pi_gate = pre + p["b_gate"]
    feats = jnp.where(pi_gate > 0, x_mag, 0.0)
    recons = (feats @ p["W_dec"] + p["b_dec"]) * p["standard_norm"] + p["mean"]
    return recons, feats, pi_gate


if __name__ == "__main__":
    key = jax.random.PRNGKey(0)
    d_input, d_hidden, batch = 256, 512, 64

    keys = jax.random.split(key, 6)
    params = init_params(keys[0], d_input, d_hidden)
    # Non-trivial statistics / gating parameters so every code path is exercised.
    params["mean"] = 0.1 * jax.random.normal(keys[1], (d_input,), jnp.float32)
    params["standard_norm"] = jnp.float32(2.5)
    params["r_mag"] = 0.1 * jax.random.normal(keys[2], (d_hidden,), jnp.float32)
    params["b_enc"] = 0.05 * jax.random.normal(keys[3], (d_hidden,), jnp.float32)
    params["b_gate"] = 0.05 * jax.random.normal(keys[4], (d_hidden,), jnp.float32)

    x = jax.random.normal(keys[5], (batch, d_input), jnp.float32)
    r_ref, f_ref, g_ref = reference_forward(x, params)

    # ---- Run 1: f32 matmuls, small tiles -> exercises the 2x2 grid, tight check.
    recons, feats, pi_gate = jax.block_until_ready(
        gated_sae_forward(x, params, tb=32, th=256,
                          matmul_dtype=jnp.float32,
                          activations_dtype=jnp.float32))

    assert jnp.allclose(pi_gate, g_ref, atol=1e-3, rtol=1e-3)
    # The gate is a hard threshold: entries with |pi_gate| at float-rounding
    # level may flip between the tiled kernel and the monolithic reference.
    stable = jnp.abs(g_ref) > 1e-3
    assert jnp.allclose(jnp.where(stable, feats, 0.0),
                        jnp.where(stable, f_ref, 0.0), atol=1e-3, rtol=1e-3)
    # Decoder / un-normalization path checked against the kernel's own feats.
    r_from_feats = ((feats @ params["W_dec"] + params["b_dec"])
                    * params["standard_norm"] + params["mean"])
    assert jnp.allclose(recons, r_from_feats, atol=1e-3, rtol=1e-3)

    # ---- Run 2: production defaults (bf16 weights, bf16 activations out).
    recons_b, feats_b, pi_gate_b = jax.block_until_ready(
        gated_sae_forward(x, params, tb=32, th=256,
                          activations_dtype=jnp.bfloat16))
    assert recons_b.shape == (batch, d_input)
    assert feats_b.shape == (batch, d_hidden) and feats_b.dtype == jnp.bfloat16
    assert jnp.all(jnp.isfinite(recons_b))
    assert jnp.allclose(pi_gate_b.astype(jnp.float32), g_ref, atol=1e-1)
    assert jnp.allclose(recons_b, r_ref, atol=1.5e-1)

    print("KERNEL_OK")
</pallas_src>

<mosaic_0001>
module attributes {stable_mosaic.version = 11 : i64} {
  func.func @gated_sae_kernel(%arg0: i32, %arg1: i32, %arg2: memref<1xf32, #tpu.memory_space<smem>>, %arg3: memref<32x256xf32, #tpu.memory_space<vmem>>, %arg4: memref<1x256xf32, #tpu.memory_space<vmem>>, %arg5: memref<256x256xf32, #tpu.memory_space<vmem>>, %arg6: memref<1x256xf32, #tpu.memory_space<vmem>>, %arg7: memref<1x256xf32, #tpu.memory_space<vmem>>, %arg8: memref<1x256xf32, #tpu.memory_space<vmem>>, %arg9: memref<256x256xf32, #tpu.memory_space<vmem>>, %arg10: memref<32x256xf32, #tpu.memory_space<vmem>>, %arg11: memref<32x256xf32, #tpu.memory_space<vmem>>, %arg12: memref<32x256xf32, #tpu.memory_space<vmem>>) attributes {dimension_semantics = [#tpu.dimension_semantics<parallel>, #tpu.dimension_semantics<arbitrary>], iteration_bounds = array<i64: 2, 2>, scalar_prefetch = 0 : i64, scratch_operands = 0 : i64, tpu.core_type = #tpu.core_type<tc>, window_params = [{transform_indices = @transform_0, window_bounds = array<i64: 1>}, {transform_indices = @transform_1, window_bounds = array<i64: 32, 256>}, {pipeline_mode = #tpu.pipeline_mode<synchronous>, transform_indices = @transform_2, window_bounds = array<i64: 1, 256>}, {transform_indices = @transform_3, window_bounds = array<i64: 256, 256>}, {transform_indices = @transform_4, window_bounds = array<i64: 1, 256>}, {transform_indices = @transform_5, window_bounds = array<i64: 1, 256>}, {transform_indices = @transform_6, window_bounds = array<i64: 1, 256>}, {transform_indices = @transform_7, window_bounds = array<i64: 256, 256>}, {transform_indices = @transform_8, window_bounds = array<i64: 32, 256>}, {transform_indices = @transform_9, window_bounds = array<i64: 32, 256>}, {transform_indices = @transform_10, window_bounds = array<i64: 32, 256>}]} {
    %c0_i32 = arith.constant 0 : i32
    %0 = arith.cmpi eq, %arg1, %c0_i32 : i32
    %1 = arith.extui %0 : i1 to i32
    %c0_i32_0 = arith.constant 0 : i32
    %2 = arith.cmpi ne, %1, %c0_i32_0 : i32
    scf.if %2 {
      %cst_25 = arith.constant 0.000000e+00 : f32
      %31 = vector.broadcast %cst_25 : f32 to vector<32x256xf32>
      %c0_26 = arith.constant 0 : index
      %c0_27 = arith.constant 0 : index
      %32 = vector.load %arg10[%c0_26, %c0_27] : memref<32x256xf32, #tpu.memory_space<vmem>>, vector<32x256xf32>
      tpu.vector_store %arg10[%c0_26, %c0_27], %31 {strides = array<i32>} : memref<32x256xf32, #tpu.memory_space<vmem>>, vector<32x256xf32>,
    } else {
    }
    %c0 = arith.constant 0 : index
    %c0_1 = arith.constant 0 : index
    %3 = vector.load %arg3[%c0, %c0_1] : memref<32x256xf32, #tpu.memory_space<vmem>>, vector<32x256xf32>
    %c0_2 = arith.constant 0 : index
    %c0_3 = arith.constant 0 : index
    %4 = vector.load %arg5[%c0_2, %c0_3] : memref<256x256xf32, #tpu.memory_space<vmem>>, vector<256x256xf32>
    %cst = arith.constant dense<0.000000e+00> : vector<32x256xf32>
    %5 = tpu.matmul %3, %4, %cst {dimension_numbers = #tpu.dot_dimension_numbers<[1], [0], [0], [1], [0, 0, 1, 1], [], []>} : vector<32x256xf32>, vector<256x256xf32>, vector<32x256xf32> -> vector<32x256xf32>
    %c0_4 = arith.constant 0 : index
    %c0_5 = arith.constant 0 : index
    %6 = vector.load %arg7[%c0_4, %c0_5] : memref<1x256xf32, #tpu.memory_space<vmem>>, vector<1x256xf32>
    %7 = vector.broadcast %6 : vector<1x256xf32> to vector<32x256xf32>
    %8 = arith.mulf %5, %7 : vector<32x256xf32>
    %c0_6 = arith.constant 0 : index
    %c0_7 = arith.constant 0 : index
    %9 = vector.load %arg6[%c0_6, %c0_7] : memref<1x256xf32, #tpu.memory_space<vmem>>, vector<1x256xf32>
    %10 = vector.broadcast %9 : vector<1x256xf32> to vector<32x256xf32>
    %11 = arith.addf %8, %10 : vector<32x256xf32>
    %cst_8 = arith.constant 0.000000e+00 : f32
    %12 = vector.broadcast %cst_8 : f32 to vector<32x256xf32>
    %13 = arith.maximumf %11, %12 : vector<32x256xf32>
    %c0_9 = arith.constant 0 : index
    %c0_10 = arith.constant 0 : index
    %14 = vector.load %arg8[%c0_9, %c0_10] : memref<1x256xf32, #tpu.memory_space<vmem>>, vector<1x256xf32>
    %15 = vector.broadcast %14 : vector<1x256xf32> to vector<32x256xf32>
    %16 = arith.addf %5, %15 : vector<32x256xf32>
    %cst_11 = arith.constant 0.000000e+00 : f32
    %17 = vector.broadcast %cst_11 : f32 to vector<32x256xf32>
    %18 = arith.cmpf ogt, %16, %17 : vector<32x256xf32>
    %cst_12 = arith.constant 0.000000e+00 : f32
    %19 = vector.broadcast %cst_12 : f32 to vector<32x256xf32>
    %20 = arith.select %18, %13, %19 : vector<32x256xi1>, vector<32x256xf32>
    %c0_13 = arith.constant 0 : index
    %c0_14 = arith.constant 0 : index
    %21 = vector.load %arg10[%c0_13, %c0_14] : memref<32x256xf32, #tpu.memory_space<vmem>>, vector<32x256xf32>
    %c0_15 = arith.constant 0 : index
    %c0_16 = arith.constant 0 : index
    %22 = vector.load %arg9[%c0_15, %c0_16] : memref<256x256xf32, #tpu.memory_space<vmem>>, vector<256x256xf32>
    %cst_17 = arith.constant dense<0.000000e+00> : vector<32x256xf32>
    %23 = tpu.matmul %20, %22, %cst_17 {dimension_numbers = #tpu.dot_dimension_numbers<[1], [0], [0], [1], [0, 0, 1, 1], [], []>} : vector<32x256xf32>, vector<256x256xf32>, vector<32x256xf32> -> vector<32x256xf32>
    %24 = arith.addf %21, %23 : vector<32x256xf32>
    %c0_18 = arith.constant 0 : index
    %c0_19 = arith.constant 0 : index
    %25 = vector.load %arg10[%c0_18, %c0_19] : memref<32x256xf32, #tpu.memory_space<vmem>>, vector<32x256xf32>
    tpu.vector_store %arg10[%c0_18, %c0_19], %24 {strides = array<i32>} : memref<32x256xf32, #tpu.memory_space<vmem>>, vector<32x256xf32>,
    %c0_20 = arith.constant 0 : index
    %c0_21 = arith.constant 0 : index
    %26 = vector.load %arg11[%c0_20, %c0_21] : memref<32x256xf32, #tpu.memory_space<vmem>>, vector<32x256xf32>
    tpu.vector_store %arg11[%c0_20, %c0_21], %20 {strides = array<i32>} : memref<32x256xf32, #tpu.memory_space<vmem>>, vector<32x256xf32>,
    %c0_22 = arith.constant 0 : index
    %c0_23 = arith.constant 0 : index
    %27 = vector.load %arg12[%c0_22, %c0_23] : memref<32x256xf32, #tpu.memory_space<vmem>>, vector<32x256xf32>
    tpu.vector_store %arg12[%c0_22, %c0_23], %16 {strides = array<i32>} : memref<32x256xf32, #tpu.memory_space<vmem>>, vector<32x256xf32>,
    %c1_i32 = arith.constant 1 : i32
    %28 = arith.cmpi eq, %arg1, %c1_i32 : i32
    %29 = arith.extui %28 : i1 to i32
    %c0_i32_24 = arith.constant 0 : i32
    %30 = arith.cmpi ne, %29, %c0_i32_24 : i32
    scf.if %30 {
      %c0_25 = arith.constant 0 : index
      %c0_26 = arith.constant 0 : index
      %31 = vector.load %arg10[%c0_25, %c0_26] : memref<32x256xf32, #tpu.memory_space<vmem>>, vector<32x256xf32>
      %c0_27 = arith.constant 0 : index
      %32 = memref.load %arg2[%c0_27] : memref<1xf32, #tpu.memory_space<smem>>
      %33 = vector.broadcast %32 : f32 to vector<32x256xf32>
      %34 = arith.mulf %31, %33 : vector<32x256xf32>
      %c0_28 = arith.constant 0 : index
      %c0_29 = arith.constant 0 : index
      %35 = vector.load %arg4[%c0_28, %c0_29] : memref<1x256xf32, #tpu.memory_space<vmem>>, vector<1x256xf32>
      %36 = vector.broadcast %35 : vector<1x256xf32> to vector<32x256xf32>
      %37 = arith.addf %34, %36 : vector<32x256xf32>
      %c0_30 = arith.constant 0 : index
      %c0_31 = arith.constant 0 : index
      %38 = vector.load %arg10[%c0_30, %c0_31] : memref<32x256xf32, #tpu.memory_space<vmem>>, vector<32x256xf32>
      tpu.vector_store %arg10[%c0_30, %c0_31], %37 {strides = array<i32>} : memref<32x256xf32, #tpu.memory_space<vmem>>, vector<32x256xf32>,
    } else {
    }
    return
  }
  func.func @transform_0(%arg0: i32, %arg1: i32) -> i32 {
    %c0_i32 = arith.constant 0 : i32
    %c0_i32_0 = arith.constant 0 : i32
    return %c0_i32 : i32
  }
  func.func @transform_1(%arg0: i32, %arg1: i32) -> (i32, i32) {
    %c0_i32 = arith.constant 0 : i32
    %c0_i32_0 = arith.constant 0 : i32
    return %arg0, %c0_i32 : i32, i32
  }
  func.func @transform_2(%arg0: i32, %arg1: i32) -> (i32, i32) {
    %c0_i32 = arith.constant 0 : i32
    %c0_i32_0 = arith.constant 0 : i32
    %c0_i32_1 = arith.constant 0 : i32
    return %c0_i32, %c0_i32_0 : i32, i32
  }
  func.func @transform_3(%arg0: i32, %arg1: i32) -> (i32, i32) {
    %c0_i32 = arith.constant 0 : i32
    %c0_i32_0 = arith.constant 0 : i32
    return %c0_i32, %arg1 : i32, i32
  }
  func.func @transform_4(%arg0: i32, %arg1: i32) -> (i32, i32) {
    %c0_i32 = arith.constant 0 : i32
    %c0_i32_0 = arith.constant 0 : i32
    return %c0_i32, %arg1 : i32, i32
  }
  func.func @transform_5(%arg0: i32, %arg1: i32) -> (i32, i32) {
    %c0_i32 = arith.constant 0 : i32
    %c0_i32_0 = arith.constant 0 : i32
    return %c0_i32, %arg1 : i32, i32
  }
  func.func @transform_6(%arg0: i32, %arg1: i32) -> (i32, i32) {
    %c0_i32 = arith.constant 0 : i32
    %c0_i32_0 = arith.constant 0 : i32
    return %c0_i32, %arg1 : i32, i32
  }
  func.func @transform_7(%arg0: i32, %arg1: i32) -> (i32, i32) {
    %c0_i32 = arith.constant 0 : i32
    %c0_i32_0 = arith.constant 0 : i32
    return %arg1, %c0_i32 : i32, i32
  }
  func.func @transform_8(%arg0: i32, %arg1: i32) -> (i32, i32) {
    %c0_i32 = arith.constant 0 : i32
    %c0_i32_0 = arith.constant 0 : i32
    return %arg0, %c0_i32 : i32, i32
  }
  func.func @transform_9(%arg0: i32, %arg1: i32) -> (i32, i32) {
    %c0_i32 = arith.constant 0 : i32
    return %arg0, %arg1 : i32, i32
  }
  func.func @transform_10(%arg0: i32, %arg1: i32) -> (i32, i32) {
    %c0_i32 = arith.constant 0 : i32
    return %arg0, %arg1 : i32, i32
  }
}

</mosaic_0001>

<bundles_post_ra>
// kernel: tpu_custom_call.1
= control target key start
LH: loop header
LB: loop body
LE: loop exit
PB: predicated region body
PF: predicated region fallthrough
CT: control target
= control target key end

     0   :  { %s2830_s0 = inlined_call_operand.<no memory space> [shape: f32[1], index: 0, kind: input, shape index: {}]   ;;  %s2831_s1 = inlined_call_operand.hbm [shape: f32[64,256], index: 1, kind: input, shape index: {}]   ;;  %s2832_s2 = inlined_call_operand.vmem [shape: f32[1,256], index: 2, kind: input, shape index: {}]   ;;  %s2833_s3 = inlined_call_operand.hbm [shape: f32[256,512], index: 3, kind: input, shape index: {}]   ;;  %s2834_s4 = inlined_call_operand.vmem [shape: f32[1,512], index: 4, kind: input, shape index: {}]   ;;  %s2835_s5 = inlined_call_operand.vmem [shape: f32[1,512], index: 5, kind: input, shape index: {}]   ;;  %s2836_s6 = inlined_call_operand.vmem [shape: f32[1,512], index: 6, kind: input, shape index: {}]   ;;  %s2837_s7 = inlined_call_operand.hbm [shape: f32[512,256], index: 7, kind: input, shape index: {}]   ;;  %s2838_s8 = inlined_call_operand.hbm [shape: f32[64,256], index: 8, kind: output, shape index: {0}]   ;;  %s2839_s9 = inlined_call_operand.hbm [shape: f32[64,512], index: 9, kind: output, shape index: {1}]   ;;  %s2840_s10 = inlined_call_operand.hbm [shape: f32[64,512], index: 10, kind: output, shape index: {2}]  }
   0x1   :  { %2872 = sst [smem:[#allocation34_spill]] %s2831_s1 }
   0x2   :  { %2873 = sst [smem:[#allocation35_spill]] %s2832_s2 }
   0x3   :  { %2874 = sst [smem:[#allocation36_spill]] %s2833_s3 }
   0x4   :  { %2875 = sst [smem:[#allocation37_spill]] %s2834_s4 }
   0x5   :  { %2876 = sst [smem:[#allocation38_spill]] %s2835_s5 }
   0x6   :  { %2877 = sst [smem:[#allocation39_spill]] %s2836_s6 }
   0x7   :  { %2878 = sst [smem:[#allocation40_spill]] %s2837_s7 }
   0x8   :  { %2879 = sst [smem:[#allocation41_spill]] %s2838_s8 }
   0x9   :  { %2880 = sst [smem:[#allocation42_spill]] %s2839_s9 }
   0xa   :  { %2881 = sst [smem:[#allocation43_spill]] %s2840_s10 }
   0xb   :  { %16 = sst [smem:[#allocation2]] %s2830_s0 }
   0xc   :  { %17 = vsyncpa [#allocation4], 0 }
   0xd   :  { %19 = vsyncpa [#allocation4 + $0x1], 0 }
   0xe   :  { %20 = vsyncpa [#allocation7], 0 }
   0xf   :  { %22 = vsyncpa [#allocation7 + $0x1], 0 }
  0x10   :  { %23 = vsyncpa [#allocation5], 0 }
  0x11   :  { %25 = vsyncpa [#allocation5 + $0x1], 0 }
  0x12   :  { %26 = vsyncpa [#allocation11], 0 }
  0x13   :  { %28 = vsyncpa [#allocation11 + $0x1], 0  ;;  %s2055_s15 = smov 0   ;;  %s2057_s16 = smov 0  }
  0x14   :  { %s2059_s17 = smov 0   ;;  %s2061_s18 = smov 0  }
  0x15   :  { %s2063_s19 = smov 0   ;;  %s2065_s20 = smov 0  }
  0x16   :  { %s2067_s0 = smov 0   ;;  %s2069_s21 = smov 0  }
  0x17   :  { %s2071_s22 = smov 0   ;;  %s2073_s23 = smov 0  }
  0x18   :  { %s2075_s24 = smov 0   ;;  %s2077_s25 = smov 0  }
  0x19   :  { %s2079_s26 = smov 0   ;;  %s2081_s27 = smov 0  }
  0x1a LB: > { %2882 = sst [smem:[#allocation17_spill]] %s1934_s16  ;;  %s2844_s28 = sadd.s32 1, %s1974_s25  ;;  %s1982_s27 = sphi %s2081_s27, %s34_s27   ;;  %s1978_s26 = sphi %s2079_s26, %s2965_s26   ;;  %s1974_s25 = sphi %s2077_s25, %s2962_s25   ;;  %s1970_s24 = sphi %s2075_s24, %s2961_s24   ;;  %s1966_s23 = sphi %s2073_s23, %s2960_s23   ;;  %s1962_s22 = sphi %s2071_s22, %s2959_s22   ;;  %s1958_s21 = sphi %s2069_s21, %s2958_s21   ;;  %s1954_s0 = sphi %s2067_s0, %s2957_s0   ;;  %s1950_s20 = sphi %s2065_s20, %s2956_s20   ;;  %s1946_s19 = sphi %s2063_s19, %s2955_s19   ;;  %s1942_s18 = sphi %s2061_s18, %s2954_s18   ;;  %s1938_s17 = sphi %s2059_s17, %s2953_s17   ;;  %s1934_s16 = sphi %s2057_s16, %s2952_s16   ;;  %s1930_s15 = sphi %s2055_s15, %s2951_s15  }
  0x1b   : > { %2883 = sst [smem:[#allocation18_spill]] %s1938_s17  ;;  %p2847_p0 = scmp.eq.s32.totalorder %s1982_s27, 0 }
  0x1c   : > { %2884 = sst [smem:[#allocation19_spill]] %s1946_s19  ;;  %p2129_p1 = scmp.ge.s32.totalorder %s2844_s28, 2 }
  0x1d   : > { %2885 = sst [smem:[#allocation20_spill]] %s1950_s20  ;;  %p128_p2 = scmp.ne.s32.totalorder %s1950_s20, %s1946_s19 }
  0x1e   : > { %2886 = sst [smem:[#allocation21_spill]] %s1958_s21  ;;  %p2846_p4 = scmp.lt.s32.totalorder %s1982_s27, 4 }
  0x1f   : > { %2887 = sst [smem:[#allocation22_spill]] %s1962_s22  ;;  %p130_p5 = por %p128_p2, %p2847_p0 }
  0x20   : > { %2888 = sst [smem:[#allocation23_spill]] %s1966_s23  ;;  %s372_s11 = sand.u32 1, %s1982_s27  }
  0x21   : > { %2889 = sst [smem:[#allocation24_spill]] %s1970_s24  ;;  %s374_s12 = sand.u32 1, %s1950_s20  }
  0x22   : > { %2890 = sst [smem:[#allocation25_spill]] %s1974_s25  ;;  %s2143_s13 = sshll.u32 %s374_s12, 9 }
  0x23   : > { %2891 = sst [smem:[#allocation26_spill]] %s1978_s26  ;;  %s1394_s14 = sshll.u32 %s1974_s25, 8 }
  0x24   : > { %s2893_s3 = sld [smem:[#allocation36_spill]]  ;;  %s376_s30 = scalar_lea.vmem [#allocation6], %s2143_s13 }
  0x25   : > { %s383_s28 = sshll.u32 %s376_s30, 4  ;;  %p2154_p6 = pnand %p2846_p4, %p130_p5  ;;  %s2158_s28 = int_to_ptr.vmem [resolvable:$true] %s383_s28 }
  0x26   : > { %s2161_s12 = scalar_lea.sflag [#allocation7], %s372_s11 }
  0x27   : > { %p2854_p9 = pneg %p2154_p6 }
  0x2a   : > { %s2149_s9 = scalar_lea.hbm %s2893_s3, %s1394_s14  ;;  %s1687_s14 = scalar_lea.hbm %s2893_s3, 16384 }
  0x2b   : > { %s1682_s8 = scalar_lea.hbm %s2149_s9, 8192  ;;  %p1688_p12 = scmp.lt.u32.totalorder %s2149_s9, %s2893_s3 }
  0x2c   : > { %p1683_p8 = scmp.ne.s32.totalorder %s2149_s9, %s1682_s8  ;;  %p1689_p13 = scmp.lt.u32.totalorder %s1687_s14, %s1682_s8 }
  0x2d   : > { %p1691_p5 = scmp.lt.u32.totalorder %s1682_s8, %s2149_s9 }
  0x2e   : > { %p1685_p10 = pnand %p2854_p9, %p1683_p8  ;;  %p1690_p2 = por %p1689_p13, %p1688_p12 }
  0x30   : > { %p1686_p11 = pneg %p1685_p10  ;;  %p1692_p4 = por %p1691_p5, %p1690_p2 }
  0x32   : > { %p1693_p3 = pnand %p1692_p4, %p1686_p11 }
  0x34   : > { %1696 = shalt.err (!%p1693_p3)
}
  0x35   : > { %s1697_s11 = scalar_lea.vmem %s2158_s28, 8192  ;;  %s1984_s10 = smov [#allocation6]  }
  0x36   : > { %p1698_p8 = scmp.ne.s32.totalorder %s2158_s28, %s1697_s11  ;;  %s1702_s30 = sshll.u32 %s1984_s10, 4  ;;  %s1703_s30 = int_to_ptr.vmem [resolvable:$false] %s1702_s30 }
  0x37   : > { %s1704_s2 = scalar_lea.vmem %s1703_s30, 16384  ;;  %p1705_p7 = scmp.lt.s32.totalorder %s2158_s28, %s1703_s30 }
  0x38   : > { %p1700_p10 = pnand %p1698_p8, %p2854_p9  ;;  %p1706_p12 = scmp.lt.s32.totalorder %s1704_s2, %s1697_s11 }
  0x3a   : > { %p1701_p0 = pneg %p1700_p10  ;;  %p1707_p13 = por %p1706_p12, %p1705_p7 }
  0x3c   : > { %p1708_p2 = pnand %p1707_p13, %p1701_p0 }
  0x3e   : > { %1711 = shalt.err (!%p1708_p2)
}
  0x3f   : > { %s1985_s6 = smov 512   ;;  %s2848_s8 = smov 256  }
  0x40   : > { %s2850_s14 = smov 16   ;;  %p437_p0 = scmp.lt.s32.totalorder %s1982_s27, 5 }
  0x41   : > { %1547 = dma.hbm_to_vmem [thread:$0]  (!%p2154_p6), %s2149_s9, 8192, %s2158_s28, %s2161_s12, %s1985_s6, %s2848_s8, %s2850_s14  }
  0x42   : > { %p2895_p3 = scmp.ge.s32.totalorder %s1982_s27, 1  ;;  %s2199_s10 = sadd.s32 4294967295, %s1982_s27  }
  0x43   : > { %s2897_s2 = sadd.s32 1, %s1974_s25  ;;  %s46_s9 = sadd.s32 1, %s1978_s26 }
  0x44   : > { %p2194_p4 = pnand %p2895_p3, %p437_p0  ;;  %s2967_s2 = smov (%p2129_p1, %s2897_s2), 0 }
  0x45   : > { %2898 = sst [smem:[#allocation27_spill]] %s2967_s2  ;;  %s74_s28 = sadd.s32 1, %s1962_s22 }
  0x46   : > { %s2896_s11 = scalar_select %p2194_p4, 1, 0 }
  0x47   : > { %s2969_s9 = smov (!%p2129_p1, %s46_s9), %s1978_s26  ;;  %p81_p7 = scmp.ne.s32.totalorder %s1962_s22, %s1958_s21 }
  0x48   : > { %p87_p11 = scmp.ne.s32.totalorder %s1958_s21, %s1954_s0  ;;  %p48_p5 = scmp.ge.s32.totalorder %s2969_s9, 2 }
  0x49   : > { %p88_p8 = scmp.eq.s32.totalorder %s2199_s10, 0  ;;  %p2899_p10 = scmp.eq.s32.totalorder %s1982_s27, 0 }
  0x4a   : > { %s118_s8 = ssub.s32 %s1974_s25, %s2967_s2  ;;  %s2971_s9 = smov (%p48_p5, %s2969_s9), 0 }
  0x4b   : > { %p2223_p12 = por %p2899_p10, %p81_p7  ;;  %2901 = sst [smem:[#allocation28_spill]] %s2971_s9 }
  0x4c   : > { %p2234_p1 = por %p88_p8, %p87_p11  ;;  %p119_p13 = scmp.eq.s32.totalorder %s118_s8, 0 }
  0x4d   : > { %s71_s14 = ssub.s32 %s1978_s26, %s2971_s9  ;;  %p2903_p2 = scmp.ne.s32.totalorder %s1946_s19, %s1942_s18 }
  0x4e   : > { %s2902_s29 = scalar_select %p2234_p1, 1, 0 }
  0x4f   : > { %p2243_p0 = por %p2903_p2, %p88_p8  ;;  %p72_p3 = scmp.eq.s32.totalorder %s71_s14, 0 }
  0x50   : > { %p262_p5 = scmp.eq.s32.totalorder %s2199_s10, 3  ;;  %s2906_s3 = sadd.s32 1, %s1950_s20 }
  0x51   : > { %s2904_s30 = scalar_select %p2243_p0, 1, 0 }
  0x52   : > { %s2251_s2 = scalar_select %p119_p13, %s1950_s20, %s2906_s3  }
  0x53   : > { %2905 = sst [smem:[#allocation29_spill]] %s2904_s30  ;;  %p2259_p10 = por %p262_p5, %p81_p7 }
  0x54   : > { %2907 = sst [smem:[#allocation30_spill]] %s2251_s2  ;;  %s2910_s9 = sadd.s32 4294967294, %s1982_s27  }
  0x55   : > { %s2254_s5 = scalar_select %p72_p3, %s1962_s22, %s74_s28  }
  0x56   : > { %s2909_s4 = scalar_select %p2259_p10, 1, 0 }
  0x57   : > { %2908 = sst [smem:[#allocation31_spill]] %s2254_s5  ;;  %p268_p9 = scmp.eq.s32.totalorder %s2910_s9, 3 }
  0x58   : > { %s276_s18 = sor.u32 %s118_s8, %s71_s14  ;;  %s279_s23 = sadd.s32 1, %s1938_s17 }
  0x59   : > { %p2269_p8 = por %p268_p9, %p87_p11  ;;  %p277_p13 = scmp.eq.s32.totalorder %s276_s18, 0 }
  0x5a   : > { %p289_p2 = scmp.ne.s32.totalorder %s1938_s17, %s1934_s16  ;;  %p295_p3 = scmp.ne.s32.totalorder %s1934_s16, %s1930_s15 }
  0x5b   : > { %s2911_s30 = scalar_select %p2269_p8, 1, 0 }
  0x5c   : > { %s2278_s3 = scalar_select %p277_p13, %s1938_s17, %s279_s23  }
  0x5d   : > { %2912 = sst [smem:[#allocation32_spill]] %s2911_s30  ;;  %p2280_p7 = por %p289_p2, %p262_p5 }
  0x5e   : > { %2913 = sst [smem:[#allocation33_spill]] %s2278_s3  ;;  %p2284_p10 = por %p295_p3, %p268_p9 }
  0x5f   : > { %s2914_s28 = scalar_select %p2280_p7, 1, 0 }
  0x60   : > { %s2915_s9 = scalar_select %p2284_p10, 1, 0 }
  0x61   : > { %s350_s8 = sand.u32 1, %s1962_s22   ;;  %s1393_s14 = sshll.u32 %s1978_s26, 10 }
  0x62   : > { %s1345_s5 = sshll.u32 %s350_s8, 6  ;;  %s2916_s1 = sld [smem:[#allocation34_spill]] }
  0x63   : > { %s354_s15 = scalar_lea.vmem [#allocation3], %s1345_s5  ;;  %p2917_p11 = scmp.lt.s32.totalorder %s1982_s27, 4 }
  0x64   : > { %s362_s23 = sshll.u32 %s354_s15, 4  ;;  %s1396_s26 = sshll.u32 %s1974_s25, 13  ;;  %s2303_s23 = int_to_ptr.vmem [resolvable:$true] %s362_s23 }
  0x65   : > { %p2299_p9 = pnand %p2917_p11, %p2223_p12  ;;  %s2306_s20 = scalar_lea.sflag [#allocation4], %s350_s8 }
  0x67   : > { %p1714_p13 = pneg %p2299_p9 }
  0x68   : > { %s2293_s30 = scalar_lea.hbm %s2916_s1, %s1393_s14  ;;  %s1717_s14 = scalar_lea.hbm %s2916_s1, 2048 }
  0x69   : > { %s1712_s2 = scalar_lea.hbm %s2293_s30, 1024  ;;  %p1718_p12 = scmp.lt.u32.totalorder %s2293_s30, %s2916_s1 }
  0x6a   : > { %p1713_p5 = scmp.ne.s32.totalorder %s2293_s30, %s1712_s2  ;;  %p1719_p11 = scmp.lt.u32.totalorder %s1717_s14, %s1712_s2 }
  0x6b   : > { %p1721_p8 = scmp.lt.u32.totalorder %s1712_s2, %s2293_s30 }
  0x6c   : > { %p1715_p2 = pnand %p1714_p13, %p1713_p5  ;;  %p1720_p10 = por %p1719_p11, %p1718_p12 }
  0x6e   : > { %p1716_p3 = pneg %p1715_p2  ;;  %p1722_p7 = por %p1721_p8, %p1720_p10 }
  0x70   : > { %p1723_p0 = pnand %p1722_p7, %p1716_p3 }
  0x72   : > { %1726 = shalt.err (!%p1723_p0)
}
  0x73   : > { %s1727_s8 = scalar_lea.vmem %s2303_s23, 1024  ;;  %s1988_s5 = smov [#allocation3]  }
  0x74   : > { %p1728_p5 = scmp.ne.s32.totalorder %s2303_s23, %s1727_s8  ;;  %s1732_s6 = sshll.u32 %s1988_s5, 4  ;;  %s1733_s6 = int_to_ptr.vmem [resolvable:$false] %s1732_s6 }
  0x75   : > { %s1734_s22 = scalar_lea.vmem %s1733_s6, 2048  ;;  %p1735_p4 = scmp.lt.s32.totalorder %s2303_s23, %s1733_s6 }
  0x76   : > { %p1730_p2 = pnand %p1728_p5, %p1714_p13  ;;  %p1736_p12 = scmp.lt.s32.totalorder %s1734_s22, %s1727_s8 }
  0x78   : > { %p1731_p1 = pneg %p1730_p2  ;;  %p1737_p11 = por %p1736_p12, %p1735_p4 }
  0x7a   : > { %p1738_p10 = pnand %p1737_p11, %p1731_p1 }
  0x7c   : > { %1741 = shalt.err (!%p1738_p10)
}
  0x7d   : > { %s2919_s2 = smov 16   ;;  %s2920_s14 = smov 256  }
  0x7e   : > { %1544 = dma.hbm_to_vmem [thread:$0]  (!%p2299_p9), %s2293_s30, 1024, %s2303_s23, %s2306_s20, %s2920_s14, %s2920_s14, %s2919_s2  }
  0x7f   : > { %s2921_s7 = sld [smem:[#allocation40_spill]]  ;;  %s421_s18 = scalar_lea.vmem [#allocation8], %s2143_s13 }
  0x80   : > { %s429_s6 = sshll.u32 %s421_s18, 4  ;;  %p2922_p1 = pneg %p2154_p6  ;;  %s2345_s6 = int_to_ptr.vmem [resolvable:$true] %s429_s6 }
  0x85   : > { %s2342_s8 = scalar_lea.hbm %s2921_s7, %s1396_s26  ;;  %s1747_s20 = scalar_lea.hbm %s2921_s7, 16384 }
  0x86   : > { %s1742_s22 = scalar_lea.hbm %s2342_s8, 8192  ;;  %p1748_p7 = scmp.lt.u32.totalorder %s2342_s8, %s2921_s7 }
  0x87   : > { %p1743_p4 = scmp.ne.s32.totalorder %s2342_s8, %s1742_s22  ;;  %p1749_p9 = scmp.lt.u32.totalorder %s1747_s20, %s1742_s22 }
  0x88   : > { %p1751_p3 = scmp.lt.u32.totalorder %s1742_s22, %s2342_s8 }
  0x89   : > { %p1745_p0 = pnand %p1743_p4, %p2922_p1  ;;  %p1750_p13 = por %p1749_p9, %p1748_p7 }
  0x8b   : > { %p1746_p8 = pneg %p1745_p0  ;;  %p1752_p5 = por %p1751_p3, %p1750_p13 }
  0x8d   : > { %p1753_p2 = pnand %p1752_p5, %p1746_p8 }
  0x8f   : > { %1756 = shalt.err (!%p1753_p2)
}
  0x90   : > { %s1757_s13 = scalar_lea.vmem %s2345_s6, 8192  ;;  %p2923_p11 = pmov %p2922_p1 }
  0x91   : > { %p1758_p12 = scmp.ne.s32.totalorder %s2345_s6, %s1757_s13  ;;  %s1989_s5 = smov [#allocation8]  }
  0x92   : > { %s1762_s18 = sshll.u32 %s1989_s5, 4  ;;  %s1763_s18 = int_to_ptr.vmem [resolvable:$false] %s1762_s18 }
  0x93   : > { %p1760_p10 = pnand %p1758_p12, %p2923_p11  ;;  %s1764_s30 = scalar_lea.vmem %s1763_s18, 16384 }
  0x94   : > { %p1765_p1 = scmp.lt.s32.totalorder %s2345_s6, %s1763_s18  ;;  %p1766_p0 = scmp.lt.s32.totalorder %s1764_s30, %s1757_s13 }
  0x95   : > { %p1761_p4 = pneg %p1760_p10 }
  0x96   : > { %p1767_p7 = por %p1766_p0, %p1765_p1 }
  0x98   : > { %p1768_p9 = pnand %p1767_p7, %p1761_p4 }
  0x9a   : > { %1771 = shalt.err (!%p1768_p9)
}
  0x9b   : > { %1550 = dma.hbm_to_vmem [thread:$0]  (!%p2154_p6), %s2342_s8, 8192, %s2345_s6, %s2161_s12, %s2920_s14, %s2920_s14, %s2919_s2  }
  0x9c   : > { %p2924_p8 = scmp.ne.s32.totalorder %s2896_s11, 0 }
  0x9d   : > { %s2377_s22 = sand.u32 (!%p2924_p8), 1, %s1958_s21   ;;  %p2925_p13 = scmp.ne.s32.totalorder (!%p2924_p8), %s2902_s29, 0 }
  0x9e   : > { %441 = sbr.rel (%p2924_p8) target bundleno = 799 (0x31f), region = 52  ;;  %s1357_s23 = sshll.u32 (!%p2924_p8), %s2377_s22, 6 }
  0x9f   : > { %s444_s20 = scalar_lea.sflag (!%p2924_p8), [#allocation4], %s2377_s22  ;;  %s2381_s26 = scalar_lea.vmem (!%p2924_p8), [#allocation3], %s1357_s23 }
  0xa5   : > { %1913 = dma.done.wait (%p2925_p13), %s444_s20, 1024  }
  0xa6   : > { %1915 = vsyncadd (%p2925_p13), %s444_s20, 4294966272  ;;  %s2926_s24 = sld [smem:[#allocation29_spill]]  ;;  %s2866_s12 = sand.u32 1, %s2199_s10  }
  0xa7   : > { %s454_s11 = sand.u32 1, %s1946_s19   ;;  %s453_s14 = scalar_lea.sflag [#allocation7], %s2866_s12 }
  0xa8   : > { %s1358_s2 = sshll.u32 %s454_s11, 9 }
  0xa9   : > { %s2391_s8 = scalar_lea.vmem [#allocation6], %s1358_s2 }
  0xac   : > { %p2927_p6 = scmp.ne.s32.totalorder %s2926_s24, 0 }
  0xae   : > { %1917 = dma.done.wait (%p2927_p6), %s453_s14, 16384  }
  0xaf   : > { %1919 = vsyncadd (%p2927_p6), %s453_s14, 4294950912  ;;  %s2928_s6 = sld [smem:[#allocation23_spill]]  ;;  %s524_s29 = sand.u32 1, %s1934_s16  }
  0xb0   : > { %s1361_s13 = sshll.u32 %s524_s29, 6  ;;  %s2929_s20 = sld [smem:[#allocation37_spill]] }
  0xb1   : > { %s2930_s12 = sld [smem:[#allocation38_spill]]  ;;  %s2931_s21 = sld [smem:[#allocation39_spill]] }
  0xb2   : > { %s2417_s3 = scalar_lea.vmem [#allocation8], %s1358_s2  ;;  %s2419_s29 = scalar_lea.vmem [#allocation9], %s1357_s23 }
  0xb3   : > { %s2421_s17 = scalar_lea.vmem [#allocation10], %s1361_s13  ;;  %s2423_s16 = scalar_lea.vmem [#allocation12], %s1361_s13 }
  0xb5   : > { %s2399_s15 = sshll.u32 %s2928_s6, 1  ;;  %p1366_p5 = scmp.ne.s32.totalorder %s2928_s6, 0 }
  0xb6   : > { %p537_p3 = scmp.lt.s32.totalorder %s2399_s15, 3  ;;  %v1990_v0 = vmov (!%p1366_p5), 0.0  }
  0xb7   : > { %560 = sbr.rel (%p1366_p5) target bundleno = 190 (0xbe), region = 68  ;;  %561 = vst [vmem:[%s2419_s29] sm:$0xff] (!%p1366_p5), %v1990_v0  ;;  %562 = vst [vmem:[%s2419_s29 + $0x8] sm:$0xff] (!%p1366_p5), %v1990_v0 }
  0xb8   : > { %s2403_s5 = scalar_select %p537_p3, %s2399_s15, 3 }
  0xb9   : > { %563 = vst [vmem:[%s2419_s29 + $0x10] sm:$0xff] (!%p1366_p5), %v1990_v0  ;;  %564 = vst [vmem:[%s2419_s29 + $0x18] sm:$0xff] (!%p1366_p5), %v1990_v0 }
  0xba   : > { %s539_s11 = scalar_lea.vmem %s2929_s20, %s2403_s5  ;;  %s544_s1 = scalar_lea.vmem %s2930_s12, %s2403_s5  ;;  %565 = vst [vmem:[%s2419_s29 + $0x20] sm:$0xff] (!%p1366_p5), %v1990_v0  ;;  %566 = vst [vmem:[%s2419_s29 + $0x28] sm:$0xff] (!%p1366_p5), %v1990_v0 }
  0xbb   : > { %s549_s19 = scalar_lea.vmem %s2931_s21, %s2403_s5  ;;  %567 = vst [vmem:[%s2419_s29 + $0x30] sm:$0xff] (!%p1366_p5), %v1990_v0  ;;  %568 = vst [vmem:[%s2419_s29 + $0x38] sm:$0xff] (!%p1366_p5), %v1990_v0 }
  0xbe PF: > { %v578_v1 = vld [vmem:[%s2391_s8 + $0x8] sm:$0xff]  ;;  %v580_v2 = vld [vmem:[%s2391_s8 + $0x18] sm:$0xff]  ;;  %v577_v3 = vld [vmem:[%s2391_s8] sm:$0xff] }
  0xbf   : > { %v1401_v4 = vpack.c.bf16 %v580_v2, %v578_v1  ;;  %v579_v5 = vld [vmem:[%s2391_s8 + $0x10] sm:$0xff]  ;;  %v582_v6 = vld [vmem:[%s2391_s8 + $0x28] sm:$0xff]  ;;  %v584_v7 = vld [vmem:[%s2391_s8 + $0x38] sm:$0xff] }
  0xc0   : > { %v1403_v8 = vpack.c.bf16 %v579_v5, %v577_v3  ;;  %v1405_v9 = vpack.c.bf16 %v584_v7, %v582_v6  ;;  %v581_v10 = vld [vmem:[%s2391_s8 + $0x20] sm:$0xff]  ;;  %v583_v11 = vld [vmem:[%s2391_s8 + $0x30] sm:$0xff]  ;;  %v586_v12 = vld [vmem:[%s2391_s8 + $0x48] sm:$0xff] }
  0xc1   : > { %1402 = vmatprep.subr.bf16.mxu0 %v1401_v4  ;;  %v588_v13 = vld [vmem:[%s2391_s8 + $0x58] sm:$0xff]  ;;  %v1407_v14 = vpack.c.bf16 %v583_v11, %v581_v10  ;;  %v585_v16 = vld [vmem:[%s2391_s8 + $0x40] sm:$0xff]  ;;  %v587_v17 = vld [vmem:[%s2391_s8 + $0x50] sm:$0xff] }
  0xc2   : > { %1404 = vmatpush1.bf16.msra.mxu0 %v1403_v8  ;;  %v1409_v15 = vpack.c.bf16 %v588_v13, %v586_v12  ;;  %v590_v18 = vld [vmem:[%s2391_s8 + $0x68] sm:$0xff]  ;;  %v592_v19 = vld [vmem:[%s2391_s8 + $0x78] sm:$0xff]  ;;  %v1411_v20 = vpack.c.bf16 %v587_v17, %v585_v16  ;;  %v589_v22 = vld [vmem:[%s2391_s8 + $0x60] sm:$0xff] }
  0xc3   : > { %1406 = vmatprep.subr.bf16.mxu0 %v1405_v9  ;;  %v1413_v21 = vpack.c.bf16 %v592_v19, %v590_v18  ;;  %v591_v23 = vld [vmem:[%s2391_s8 + $0x70] sm:$0xff]  ;;  %v594_v24 = vld [vmem:[%s2391_s8 + $0x88] sm:$0xff]  ;;  %v596_v25 = vld [vmem:[%s2391_s8 + $0x98] sm:$0xff] }
  0xc4   : > { %v1415_v26 = vpack.c.bf16 %v591_v23, %v589_v22  ;;  %v1417_v27 = vpack.c.bf16 %v596_v25, %v594_v24  ;;  %v593_v28 = vld [vmem:[%s2391_s8 + $0x80] sm:$0xff]  ;;  %v595_v29 = vld [vmem:[%s2391_s8 + $0x90] sm:$0xff]  ;;  %v598_v30 = vld [vmem:[%s2391_s8 + $0xa8] sm:$0xff] }
  0xc5   : > { %v600_v31 = vld [vmem:[%s2391_s8 + $0xb8] sm:$0xff]  ;;  %v1419_v32 = vpack.c.bf16 %v595_v29, %v593_v28  ;;  %v597_v34 = vld [vmem:[%s2391_s8 + $0xa0] sm:$0xff]  ;;  %v599_v35 = vld [vmem:[%s2391_s8 + $0xb0] sm:$0xff] }
  0xc6   : > { %1408 = vmatpush1.bf16.msra.mxu0 %v1407_v14  ;;  %v1421_v33 = vpack.c.bf16 %v600_v31, %v598_v30  ;;  %v602_v36 = vld [vmem:[%s2391_s8 + $0xc8] sm:$0xff]  ;;  %v604_v37 = vld [vmem:[%s2391_s8 + $0xd8] sm:$0xff]  ;;  %v1423_v38 = vpack.c.bf16 %v599_v35, %v597_v34  ;;  %v601_v40 = vld [vmem:[%s2391_s8 + $0xc0] sm:$0xff] }
  0xc7   : > { %1410 = vmatprep.subr.bf16.mxu0 %v1409_v15  ;;  %v1425_v39 = vpack.c.bf16 %v604_v37, %v602_v36  ;;  %v603_v41 = vld [vmem:[%s2391_s8 + $0xd0] sm:$0xff]  ;;  %v570_v42 = vld [vmem:[%s2381_s26 + $0x8] sm:$0xff]  ;;  %v608_v44 = vld [vmem:[%s2391_s8 + $0xf8] sm:$0xff] }
  0xc8   : > { %v606_v43 = vld [vmem:[%s2391_s8 + $0xe8] sm:$0xff]  ;;  %705 = vmatprep.mubr.f32.mxu0 %v570_v42  ;;  %v605_v45 = vld [vmem:[%s2391_s8 + $0xe0] sm:$0xff]  ;;  %v607_v46 = vld [vmem:[%s2391_s8 + $0xf0] sm:$0xff]  ;;  %v1427_v47 = vpack.c.bf16 %v603_v41, %v601_v40 }
  0xc9   : > { %v610_v48 = vld [vmem:[%s2391_s8 + $0x108] sm:$0xff]  ;;  %v612_v49 = vld [vmem:[%s2391_s8 + $0x118] sm:$0xff]  ;;  %v822_v52 = vld [vmem:[%s2417_s3] sm:$0xff]  ;;  %v1429_v53 = vpack.c.bf16 %v608_v44, %v606_v43  ;;  %v1431_v0 = vpack.c.bf16 %v607_v46, %v605_v45 }
  0xca   : > { %1412 = vmatpush1.bf16.msra.mxu0 %v1411_v20  ;;  %v823_v50 = vld [vmem:[%s2417_s3 + $0x8] sm:$0xff]  ;;  %v825_v51 = vld [vmem:[%s2417_s3 + $0x18] sm:$0xff]  ;;  %v824_v55 = vld [vmem:[%s2417_s3 + $0x10] sm:$0xff]  ;;  %v1433_v4 = vpack.c.bf16 %v612_v49, %v610_v48 }
  0xcb   : > { %1414 = vmatprep.subr.bf16.mxu0 %v1413_v21  ;;  %v1465_v54 = vpack.c.bf16 %v825_v51, %v823_v50  ;;  %v827_v56 = vld [vmem:[%s2417_s3 + $0x28] sm:$0xff]  ;;  %v829_v57 = vld [vmem:[%s2417_s3 + $0x38] sm:$0xff]  ;;  %v1467_v58 = vpack.c.bf16 %v824_v55, %v822_v52  ;;  %v826_v60 = vld [vmem:[%s2417_s3 + $0x20] sm:$0xff] }
  0xcc   : > { %v1469_v59 = vpack.c.bf16 %v829_v57, %v827_v56  ;;  %v828_v61 = vld [vmem:[%s2417_s3 + $0x30] sm:$0xff]  ;;  %v831_v62 = vld [vmem:[%s2417_s3 + $0x48] sm:$0xff]  ;;  %v833_v63 = vld [vmem:[%s2417_s3 + $0x58] sm:$0xff] }
  0xcd   : > { %1466 = vmatprep.subr.bf16.mxu1 %v1465_v54  ;;  %v609_v1 = vld [vmem:[%s2391_s8 + $0x100] sm:$0xff]  ;;  %v611_v2 = vld [vmem:[%s2391_s8 + $0x110] sm:$0xff]  ;;  %v1471_v3 = vpack.c.bf16 %v828_v61, %v826_v60  ;;  %v614_v5 = vld [vmem:[%s2391_s8 + $0x128] sm:$0xff]  ;;  %v1473_v6 = vpack.c.bf16 %v833_v63, %v831_v62 }
  0xce   : > { %1416 = vmatpush1.bf16.msra.mxu0 %v1415_v26  ;;  %1468 = vmatpush1.bf16.msra.mxu1 %v1467_v58  ;;  %v830_v7 = vld [vmem:[%s2417_s3 + $0x40] sm:$0xff]  ;;  %v832_v8 = vld [vmem:[%s2417_s3 + $0x50] sm:$0xff]  ;;  %v616_v9 = vld [vmem:[%s2391_s8 + $0x138] sm:$0xff]  ;;  %v1435_v12 = vpack.c.bf16 %v611_v2, %v609_v1 }
  0xcf   : > { %1418 = vmatprep.subr.bf16.mxu0 %v1417_v27  ;;  %1470 = vmatprep.subr.bf16.mxu1 %v1469_v59  ;;  %v835_v10 = vld [vmem:[%s2417_s3 + $0x68] sm:$0xff]  ;;  %v837_v11 = vld [vmem:[%s2417_s3 + $0x78] sm:$0xff]  ;;  %v613_v13 = vld [vmem:[%s2391_s8 + $0x120] sm:$0xff]  ;;  %v1475_v15 = vpack.c.bf16 %v832_v8, %v830_v7  ;;  %v1437_v16 = vpack.c.bf16 %v616_v9, %v614_v5 }
  0xd0   : > { %v615_v14 = vld [vmem:[%s2391_s8 + $0x130] sm:$0xff]  ;;  %v618_v17 = vld [vmem:[%s2391_s8 + $0x148] sm:$0xff]  ;;  %v1477_v18 = vpack.c.bf16 %v837_v11, %v835_v10  ;;  %v834_v19 = vld [vmem:[%s2417_s3 + $0x60] sm:$0xff] }
  0xd1   : > { %v836_v20 = vld [vmem:[%s2417_s3 + $0x70] sm:$0xff]  ;;  %v620_v21 = vld [vmem:[%s2391_s8 + $0x158] sm:$0xff]  ;;  %v839_v22 = vld [vmem:[%s2417_s3 + $0x88] sm:$0xff]  ;;  %v1439_v24 = vpack.c.bf16 %v615_v14, %v613_v13 }
  0xd2   : > { %1420 = vmatpush1.bf16.msra.mxu0 %v1419_v32  ;;  %1472 = vmatpush1.bf16.msra.mxu1 %v1471_v3  ;;  %v841_v23 = vld [vmem:[%s2417_s3 + $0x98] sm:$0xff]  ;;  %v617_v25 = vld [vmem:[%s2391_s8 + $0x140] sm:$0xff]  ;;  %v619_v26 = vld [vmem:[%s2391_s8 + $0x150] sm:$0xff]  ;;  %v1479_v27 = vpack.c.bf16 %v836_v20, %v834_v19  ;;  %v1441_v28 = vpack.c.bf16 %v620_v21, %v618_v17 }
  0xd3   : > { %1422 = vmatprep.subr.bf16.mxu0 %v1421_v33  ;;  %1474 = vmatprep.subr.bf16.mxu1 %v1473_v6  ;;  %v622_v29 = vld [vmem:[%s2391_s8 + $0x168] sm:$0xff]  ;;  %v1481_v30 = vpack.c.bf16 %v841_v23, %v839_v22  ;;  %v838_v31 = vld [vmem:[%s2417_s3 + $0x80] sm:$0xff]  ;;  %v840_v32 = vld [vmem:[%s2417_s3 + $0x90] sm:$0xff]  ;;  %v1443_v36 = vpack.c.bf16 %v619_v26, %v617_v25 }
  0xd4   : > { %v624_v33 = vld [vmem:[%s2391_s8 + $0x178] sm:$0xff]  ;;  %v843_v34 = vld [vmem:[%s2417_s3 + $0xa8] sm:$0xff]  ;;  %v621_v37 = vld [vmem:[%s2391_s8 + $0x160] sm:$0xff] }
  0xd5   : > { %v845_v35 = vld [vmem:[%s2417_s3 + $0xb8] sm:$0xff]  ;;  %v1445_v40 = vpack.c.bf16 %v624_v33, %v622_v29  ;;  %v626_v41 = vld [vmem:[%s2391_s8 + $0x188] sm:$0xff]  ;;  %v842_v43 = vld [vmem:[%s2417_s3 + $0xa0] sm:$0xff] }
  0xd6   : > { %1424 = vmatpush1.bf16.msra.mxu0 %v1423_v38  ;;  %1476 = vmatpush1.bf16.msra.mxu1 %v1475_v15  ;;  %v623_v38 = vld [vmem:[%s2391_s8 + $0x170] sm:$0xff]  ;;  %v1485_v42 = vpack.c.bf16 %v845_v35, %v843_v34  ;;  %v628_v45 = vld [vmem:[%s2391_s8 + $0x198] sm:$0xff]  ;;  %v847_v46 = vld [vmem:[%s2417_s3 + $0xc8] sm:$0xff] }
  0xd7   : > { %1426 = vmatprep.subr.bf16.mxu0 %v1425_v39  ;;  %1478 = vmatprep.subr.bf16.mxu1 %v1477_v18  ;;  %v1483_v39 = vpack.c.bf16 %v840_v32, %v838_v31  ;;  %v844_v44 = vld [vmem:[%s2417_s3 + $0xb0] sm:$0xff]  ;;  %v1447_v48 = vpack.c.bf16 %v623_v38, %v621_v37  ;;  %v625_v49 = vld [vmem:[%s2391_s8 + $0x180] sm:$0xff]  ;;  %v1449_v52 = vpack.c.bf16 %v628_v45, %v626_v41  ;;  %v632_v57 = vld [vmem:[%s2391_s8 + $0x1b8] sm:$0xff] }
  0xd8   : > { %v627_v50 = vld [vmem:[%s2391_s8 + $0x190] sm:$0xff]  ;;  %v1487_v51 = vpack.c.bf16 %v844_v44, %v842_v43  ;;  %v846_v55 = vld [vmem:[%s2417_s3 + $0xc0] sm:$0xff]  ;;  %v851_v58 = vld [vmem:[%s2417_s3 + $0xe8] sm:$0xff] }
  0xd9   : > { %v848_v56 = vld [vmem:[%s2417_s3 + $0xd0] sm:$0xff]  ;;  %v853_v59 = vld [vmem:[%s2417_s3 + $0xf8] sm:$0xff]  ;;  %v1451_v60 = vpack.c.bf16 %v627_v50, %v625_v49  ;;  %v629_v61 = vld [vmem:[%s2391_s8 + $0x1a0] sm:$0xff] }
  0xda   : > { %1428 = vmatpush1.bf16.msra.mxu0 %v1427_v47  ;;  %1480 = vmatpush1.bf16.msra.mxu1 %v1479_v27  ;;  %v849_v47 = vld [vmem:[%s2417_s3 + $0xd8] sm:$0xff]  ;;  %v631_v62 = vld [vmem:[%s2391_s8 + $0x1b0] sm:$0xff]  ;;  %v1491_v63 = vpack.c.bf16 %v848_v56, %v846_v55  ;;  %v634_v1 = vld [vmem:[%s2391_s8 + $0x1c8] sm:$0xff]  ;;  %v1493_v2 = vpack.c.bf16 %v853_v59, %v851_v58 }
  0xdb   : > { %1430 = vmatprep.subr.bf16.mxu0 %v1429_v53  ;;  %1482 = vmatprep.subr.bf16.mxu1 %v1481_v30  ;;  %v630_v53 = vld [vmem:[%s2391_s8 + $0x1a8] sm:$0xff]  ;;  %v1489_v54 = vpack.c.bf16 %v849_v47, %v847_v46  ;;  %v850_v3 = vld [vmem:[%s2417_s3 + $0xe0] sm:$0xff]  ;;  %v636_v5 = vld [vmem:[%s2391_s8 + $0x1d8] sm:$0xff]  ;;  %v1455_v8 = vpack.c.bf16 %v631_v62, %v629_v61 }
  0xdc   : > { %v855_v6 = vld [vmem:[%s2417_s3 + $0x108] sm:$0xff]  ;;  %v857_v7 = vld [vmem:[%s2417_s3 + $0x118] sm:$0xff]  ;;  %v633_v9 = vld [vmem:[%s2391_s8 + $0x1c0] sm:$0xff] }
  0xdd   : > { %v635_v10 = vld [vmem:[%s2391_s8 + $0x1d0] sm:$0xff]  ;;  %v638_v13 = vld [vmem:[%s2391_s8 + $0x1e8] sm:$0xff]  ;;  %v1497_v14 = vpack.c.bf16 %v857_v7, %v855_v6  ;;  %v854_v15 = vld [vmem:[%s2417_s3 + $0x100] sm:$0xff] }
  0xde   : > { %1432 = vmatpush1.bf16.msra.mxu0 %v1431_v0  ;;  %1484 = vmatpush1.bf16.msra.mxu1 %v1483_v39  ;;  %v1453_v0 = vpack.c.bf16 %v632_v57, %v630_v53  ;;  %v640_v17 = vld [vmem:[%s2391_s8 + $0x1f8] sm:$0xff]  ;;  %v859_v18 = vld [vmem:[%s2417_s3 + $0x128] sm:$0xff]  ;;  %v1459_v20 = vpack.c.bf16 %v635_v10, %v633_v9  ;;  %v637_v21 = vld [vmem:[%s2391_s8 + $0x1e0] sm:$0xff]  ;;  %v732_v9 = vlaneseq }
  0xdf   : > { %1434 = vmatprep.subr.bf16.mxu0 %v1433_v4  ;;  %1486 = vmatprep.subr.bf16.mxu1 %v1485_v42  ;;  %v852_v4 = vld [vmem:[%s2417_s3 + $0xf0] sm:$0xff]  ;;  %v861_v19 = vld [vmem:[%s2417_s3 + $0x138] sm:$0xff]  ;;  %v1461_v23 = vpack.c.bf16 %v640_v17, %v638_v13  ;;  %v858_v26 = vld [vmem:[%s2417_s3 + $0x120] sm:$0xff] }
  0xe0   : > { %v1495_v11 = vpack.c.bf16 %v852_v4, %v850_v3  ;;  %v1501_v25 = vpack.c.bf16 %v861_v19, %v859_v18  ;;  %v860_v27 = vld [vmem:[%s2417_s3 + $0x130] sm:$0xff]  ;;  %v865_v29 = vld [vmem:[%s2417_s3 + $0x158] sm:$0xff]  ;;  %v862_v33 = vld [vmem:[%s2417_s3 + $0x140] sm:$0xff]  ;;  %v733_v10 = vshrl.u32 %v732_v9, 7 }
  0xe1   : > { %v1503_v31 = vpack.c.bf16 %v860_v27, %v858_v26  ;;  %v864_v34 = vld [vmem:[%s2417_s3 + $0x150] sm:$0xff]  ;;  %v867_v35 = vld [vmem:[%s2417_s3 + $0x168] sm:$0xff]  ;;  %v569_v37 = vld [vmem:[%s2381_s26] sm:$0xff] }
  0xe2   : > { %1436 = vmatpush1.bf16.msra.mxu0 %v1435_v12  ;;  %1488 = vmatpush1.bf16.msra.mxu1 %v1487_v51  ;;  %v1457_v12 = vpack.c.bf16 %v636_v5, %v634_v1  ;;  %v1507_v38 = vpack.c.bf16 %v864_v34, %v862_v33  ;;  %v572_v39 = vld [vmem:[%s2381_s26 + $0x18] sm:$0xff]  ;;  %v866_v41 = vld [vmem:[%s2417_s3 + $0x160] sm:$0xff]  ;;  %v868_v42 = vld [vmem:[%s2417_s3 + $0x170] sm:$0xff] }
  0xe3   : > { %1438 = vmatprep.subr.bf16.mxu0 %v1437_v16  ;;  %1490 = vmatprep.subr.bf16.mxu1 %v1489_v54  ;;  %v856_v16 = vld [vmem:[%s2417_s3 + $0x110] sm:$0xff]  ;;  %v871_v43 = vld [vmem:[%s2417_s3 + $0x188] sm:$0xff]  ;;  %v873_v44 = vld [vmem:[%s2417_s3 + $0x198] sm:$0xff]  ;;  %v1511_v46 = vpack.c.bf16 %v868_v42, %v866_v41 }
  0xe4   : > { %v1499_v22 = vpack.c.bf16 %v856_v16, %v854_v15  ;;  %v571_v45 = vld [vmem:[%s2381_s26 + $0x10] sm:$0xff]  ;;  %v574_v47 = vld [vmem:[%s2381_s26 + $0x28] sm:$0xff]  ;;  %v870_v49 = vld [vmem:[%s2417_s3 + $0x180] sm:$0xff] }
  0xe5   : > { %v872_v50 = vld [vmem:[%s2417_s3 + $0x190] sm:$0xff]  ;;  %v875_v51 = vld [vmem:[%s2417_s3 + $0x1a8] sm:$0xff]  ;;  %v573_v53 = vld [vmem:[%s2381_s26 + $0x20] sm:$0xff] }
  0xe6   : > { %1440 = vmatpush1.bf16.msra.mxu0 %v1439_v24  ;;  %1492 = vmatpush1.bf16.msra.mxu1 %v1491_v63  ;;  %v639_v24 = vld [vmem:[%s2391_s8 + $0x1f0] sm:$0xff]  ;;  %v1515_v54 = vpack.c.bf16 %v872_v50, %v870_v49  ;;  %v576_v55 = vld [vmem:[%s2381_s26 + $0x38] sm:$0xff]  ;;  %v874_v57 = vld [vmem:[%s2417_s3 + $0x1a0] sm:$0xff] }
  0xe7   : > { %1442 = vmatprep.subr.bf16.mxu0 %v1441_v28  ;;  %1494 = vmatprep.subr.bf16.mxu1 %v1493_v2  ;;  %v863_v28 = vld [vmem:[%s2417_s3 + $0x148] sm:$0xff]  ;;  %v1463_v30 = vpack.c.bf16 %v639_v24, %v637_v21  ;;  %v876_v58 = vld [vmem:[%s2417_s3 + $0x1b0] sm:$0xff]  ;;  %v881_v62 = vld [vmem:[%s2417_s3 + $0x1d8] sm:$0xff] }
  0xe8   : > { %v1505_v32 = vpack.c.bf16 %v865_v29, %v863_v28  ;;  %v575_v59 = vld [vmem:[%s2381_s26 + $0x30] sm:$0xff]  ;;  %v879_v61 = vld [vmem:[%s2417_s3 + $0x1c8] sm:$0xff]  ;;  %v878_v63 = vld [vmem:[%s2417_s3 + $0x1c0] sm:$0xff] }
  0xe9   : > { %v1521_v1 = vpack.c.bf16 %v881_v62, %v879_v61  ;;  %v883_v3 = vld [vmem:[%s2417_s3 + $0x1e8] sm:$0xff]  ;;  %v885_v4 = vld [vmem:[%s2417_s3 + $0x1f8] sm:$0xff]  ;;  %v882_v6 = vld [vmem:[%s2417_s3 + $0x1e0] sm:$0xff] }
  0xea   : > { %1444 = vmatpush1.bf16.msra.mxu0 %v1443_v36  ;;  %1496 = vmatpush1.bf16.msra.mxu1 %v1495_v11  ;;  %v869_v36 = vld [vmem:[%s2417_s3 + $0x178] sm:$0xff]  ;;  %v1525_v5 = vpack.c.bf16 %v885_v4, %v883_v3  ;;  %v884_v7 = vld [vmem:[%s2417_s3 + $0x1f0] sm:$0xff]  ;;  %v2570_v11 = vsub.s32 0, %v733_v10  ;;  %v778_v13 = vld [vmem:[%s549_s19] sm:$0x3] }
  0xeb   : > { %1446 = vmatprep.subr.bf16.mxu0 %v1445_v40  ;;  %1498 = vmatprep.subr.bf16.mxu1 %v1497_v14  ;;  %v1509_v40 = vpack.c.bf16 %v869_v36, %v867_v35  ;;  %v2582_v14 = vsub.s32 1, %v733_v10  ;;  %v750_v15 = vld [vmem:[%s539_s11] sm:$0x3] }
  0xec   : > { %v783_v17 = vrot.slane %v778_v13, %v2570_v11 }
  0xed   : > { %v787_v19 = vrot.slane %v778_v13, %v2582_v14  ;;  %v816_v13 = vld [vmem:[%s2419_s29 + $0x10] sm:$0xff] }
  0xee   : > { %1448 = vmatpush1.bf16.msra.mxu0 %v1447_v48  ;;  %1500 = vmatpush1.bf16.msra.mxu1 %v1499_v22  ;;  %v1513_v48 = vpack.c.bf16 %v873_v44, %v871_v43  ;;  %v2595_v22 = vrot.slane %v750_v15, %v2582_v14 }
  0xef   : > { %1450 = vmatprep.subr.bf16.mxu0 %v1449_v52  ;;  %1502 = vmatprep.subr.bf16.mxu1 %v1501_v25  ;;  %v877_v52 = vld [vmem:[%s2417_s3 + $0x1b8] sm:$0xff] }
  0xf0   : > { %v1517_v56 = vpack.c.bf16 %v877_v52, %v875_v51 }
  0xf2   : > { %1452 = vmatpush1.bf16.msra.mxu0 %v1451_v60  ;;  %1504 = vmatpush1.bf16.msra.mxu1 %v1503_v31  ;;  %v1519_v60 = vpack.c.bf16 %v876_v58, %v874_v57 }
  0xf3   : > { %1454 = vmatprep.subr.bf16.mxu0 %v1453_v0  ;;  %1506 = vmatprep.subr.bf16.mxu1 %v1505_v32  ;;  %v880_v0 = vld [vmem:[%s2417_s3 + $0x1d0] sm:$0xff] }
  0xf4   : > { %v1523_v2 = vpack.c.bf16 %v880_v0, %v878_v63 }
  0xf6   : > { %1456 = vmatpush1.bf16.msra.mxu0 %v1455_v8  ;;  %1508 = vmatpush1.bf16.msra.mxu1 %v1507_v38  ;;  %v1527_v8 = vpack.c.bf16 %v884_v7, %v882_v6  ;;  %v814_v6 = vld [vmem:[%s2419_s29] sm:$0xff]  ;;  %v815_v7 = vld [vmem:[%s2419_s29 + $0x8] sm:$0xff] }
  0xf7   : > { %1458 = vmatprep.subr.bf16.mxu0 %v1457_v12  ;;  %1510 = vmatprep.subr.bf16.mxu1 %v1509_v40  ;;  %v730_v12 = vld [vmem:[%s544_s1] sm:$0x3]  ;;  %s2935_s1 = sld [smem:[#allocation23_spill]] }
  0xf8   : > { %v735_v16 = vrot.slane %v730_v12, %v2570_v11  ;;  %v739_v18 = vrot.slane %v730_v12, %v2582_v14 }
  0xfa   : > { %1460 = vmatpush1.bf16.msra.mxu0 %v1459_v20  ;;  %1512 = vmatpush1.bf16.msra.mxu1 %v1511_v46  ;;  %v755_v20 = vrot.slane %v750_v15, %v2570_v11  ;;  %v817_v15 = vld [vmem:[%s2419_s29 + $0x18] sm:$0xff] }
  0xfb   : > { %1462 = vmatprep.subr.bf16.mxu0 %v1461_v23  ;;  %1514 = vmatprep.subr.bf16.mxu1 %v1513_v48 }
  0xfd   : > { %p1375_p2 = scmp.ne.s32.totalorder %s2935_s1, 1 }
  0xfe   : > { %1464 = vmatpush1.bf16.msra.mxu0 %v1463_v30  ;;  %1516 = vmatpush1.bf16.msra.mxu1 %v1515_v54  ;;  %s1019_s19 = sld [smem:[#allocation2]] (!%p1375_p2)  ;;  %s2936_s5 = sld [smem:[#allocation35_spill]] (!%p1375_p2) }
  0xff   : > { %1518 = vmatprep.subr.bf16.mxu1 %v1517_v56 }
 0x101   : > { %706 = vmatmul.mubr.f32.vlgmr.msra.gmra.mrb[0].mxu0 %v569_v37 }
 0x102   : > { %711 = vmatprep.mubr.f32.mxu0 %v572_v39  ;;  %1520 = vmatpush1.bf16.msra.mxu1 %v1519_v60 }
 0x103   : > { %1522 = vmatprep.subr.bf16.mxu1 %v1521_v1 }
 0x105   : > { %712 = vmatmul.mubr.f32.gmra.mrb[2].mxu0 %v571_v45 }
 0x106   : > { %717 = vmatprep.mubr.f32.mxu0 %v574_v47  ;;  %1524 = vmatpush1.bf16.msra.mxu1 %v1523_v2 }
 0x107   : > { %1526 = vmatprep.subr.bf16.mxu1 %v1525_v5 }
 0x109   : > { %718 = vmatmul.mubr.f32.gmra.mrb[4].mxu0 %v573_v53 }
 0x10a   : > { %723 = vmatprep.mubr.f32.mxu0 %v576_v55  ;;  %1528 = vmatpush1.bf16.msra.mxu1 %v1527_v8 }
 0x10d   : > { %724 = vmatmul.mubr.f32.gmra.mrb[6].mxu0 %v575_v59 }
 0x1d4   : > { %v707_v21 = vpop.f32.mrb[0].mxu0 }
 0x1d5   : > { %v742_v23 = vmul.f32 %v735_v16, %v707_v21  ;;  %v790_v24 = vadd.f32 %v783_v17, %v707_v21  ;;  %v709_v25 = vpop.f32.mrb[1].mxu0  ;;  %v819_v21 = vld [vmem:[%s2419_s29 + $0x28] sm:$0xff] }
 0x1d6   : > { %v743_v26 = vmul.f32 %v739_v18, %v709_v25  ;;  %v791_v27 = vadd.f32 %v787_v19, %v709_v25 }
 0x1d7   : > { %v762_v28 = vadd.f32 %v755_v20, %v742_v23  ;;  %999 = vst [vmem:[%s2423_s16] sm:$0xff] %v790_v24  ;;  %vm798_vm0 = vcmp.gt.f32.partialorder %v790_v24, 0.0 }
 0x1d8   : > { %1000 = vst [vmem:[%s2423_s16 + $0x8] sm:$0xff] %v791_v27  ;;  %v713_v29 = vpop.f32.mrb[2].mxu0  ;;  %v763_v30 = vadd.f32 %v2595_v22, %v743_v26  ;;  %vm799_vm1 = vcmp.gt.f32.partialorder %v791_v27, 0.0  ;;  %v820_v26 = vld [vmem:[%s2419_s29 + $0x30] sm:$0xff]  ;;  %v821_v27 = vld [vmem:[%s2419_s29 + $0x38] sm:$0xff] }
 0x1d9   : > { %v770_v31 = vmax.f32 %v762_v28, 0.0  ;;  %v744_v32 = vmul.f32 %v735_v16, %v713_v29  ;;  %v792_v33 = vadd.f32 %v783_v17, %v713_v29  ;;  %v715_v34 = vpop.f32.mrb[3].mxu0 }
 0x1da   : > { %v745_v35 = vmul.f32 %v739_v18, %v715_v34  ;;  %v793_v36 = vadd.f32 %v787_v19, %v715_v34  ;;  %v771_v37 = vmax.f32 %v763_v30, 0.0 }
 0x1db   : > { %v764_v38 = vadd.f32 %v755_v20, %v744_v32  ;;  %1001 = vst [vmem:[%s2423_s16 + $0x10] sm:$0xff] %v792_v33  ;;  %v806_v39 = vsel %vm798_vm0, %v770_v31, 0.0  ;;  %vm800_vm2 = vcmp.gt.f32.partialorder %v792_v33, 0.0  ;;  %v1029_v32 = vld [vmem:[%s2936_s5] sm:$0x3] (!%p1375_p2) }
 0x1dc   : > { %v765_v40 = vadd.f32 %v2595_v22, %v745_v35  ;;  %1002 = vst [vmem:[%s2423_s16 + $0x18] sm:$0xff] %v793_v36  ;;  %v719_v41 = vpop.f32.mrb[4].mxu0  ;;  %v807_v42 = vsel %vm799_vm1, %v771_v37, 0.0  ;;  %1367 = vmatprep.mubr.msk.f32.mxu1 %vm799_vm1, %v771_v37  ;;  %991 = vst [vmem:[%s2421_s17] sm:$0xff] %v806_v39  ;;  %vm801_vm3 = vcmp.gt.f32.partialorder %v793_v36, 0.0  ;;  %v1038_v39 = vrot.slane (!%p1375_p2), %v1029_v32, %v2582_v14 }
 0x1dd   : > { %v772_v43 = vmax.f32 %v764_v38, 0.0  ;;  %v746_v44 = vmul.f32 %v735_v16, %v719_v41  ;;  %v794_v45 = vadd.f32 %v783_v17, %v719_v41  ;;  %992 = vst [vmem:[%s2421_s17 + $0x8] sm:$0xff] %v807_v42  ;;  %v721_v46 = vpop.f32.mrb[5].mxu0  ;;  %1368 = vmatmul.mubr.msk.f32.vlgmr.msra.gmra.mrb[0].mxu1 %vm798_vm0, %v770_v31  ;;  %v1034_v38 = vrot.slane (!%p1375_p2), %v1029_v32, %v2570_v11 }
 0x1de   : > { %v773_v47 = vmax.f32 %v765_v40, 0.0  ;;  %v747_v48 = vmul.f32 %v739_v18, %v721_v46  ;;  %v795_v49 = vadd.f32 %v787_v19, %v721_v46 }
 0x1df   : > { %v766_v50 = vadd.f32 %v755_v20, %v746_v44  ;;  %1003 = vst [vmem:[%s2423_s16 + $0x20] sm:$0xff] %v794_v45  ;;  %v808_v51 = vsel %vm800_vm2, %v772_v43, 0.0  ;;  %vm802_vm4 = vcmp.gt.f32.partialorder %v794_v45, 0.0 }
 0x1e0   : > { %v767_v52 = vadd.f32 %v2595_v22, %v747_v48  ;;  %1004 = vst [vmem:[%s2423_s16 + $0x28] sm:$0xff] %v795_v49  ;;  %v725_v53 = vpop.f32.mrb[6].mxu0  ;;  %v809_v54 = vsel %vm801_vm3, %v773_v47, 0.0  ;;  %1369 = vmatprep.mubr.msk.f32.mxu1 %vm801_vm3, %v773_v47  ;;  %993 = vst [vmem:[%s2421_s17 + $0x10] sm:$0xff] %v808_v51  ;;  %vm803_vm5 = vcmp.gt.f32.partialorder %v795_v49, 0.0 }
 0x1e1   : > { %v774_v55 = vmax.f32 %v766_v50, 0.0  ;;  %v748_v56 = vmul.f32 %v735_v16, %v725_v53  ;;  %v796_v57 = vadd.f32 %v783_v17, %v725_v53  ;;  %994 = vst [vmem:[%s2421_s17 + $0x18] sm:$0xff] %v809_v54  ;;  %v727_v58 = vpop.f32.mrb[7].mxu0  ;;  %1370 = vmatmul.mubr.msk.f32.gmra.mrb[2].mxu1 %vm800_vm2, %v772_v43  ;;  %v1020_v43 = vstv (!%p1375_p2), %s1019_s19 }
 0x1e2   : > { %v775_v59 = vmax.f32 %v767_v52, 0.0  ;;  %v749_v60 = vmul.f32 %v739_v18, %v727_v58  ;;  %v797_v61 = vadd.f32 %v787_v19, %v727_v58 }
 0x1e3   : > { %v768_v62 = vadd.f32 %v755_v20, %v748_v56  ;;  %1005 = vst [vmem:[%s2423_s16 + $0x30] sm:$0xff] %v796_v57  ;;  %v810_v63 = vsel %vm802_vm4, %v774_v55, 0.0  ;;  %vm804_vm6 = vcmp.gt.f32.partialorder %v796_v57, 0.0  ;;  %v818_v20 = vld [vmem:[%s2419_s29 + $0x20] sm:$0xff] }
 0x1e4   : > { %v769_v0 = vadd.f32 %v2595_v22, %v749_v60  ;;  %1006 = vst [vmem:[%s2423_s16 + $0x38] sm:$0xff] %v797_v61  ;;  %v811_v1 = vsel %vm803_vm5, %v775_v59, 0.0  ;;  %1371 = vmatprep.mubr.msk.f32.mxu1 %vm803_vm5, %v775_v59  ;;  %995 = vst [vmem:[%s2421_s17 + $0x20] sm:$0xff] %v810_v63  ;;  %vm805_vm7 = vcmp.gt.f32.partialorder %v797_v61, 0.0 }
 0x1e5   : > { %v776_v2 = vmax.f32 %v768_v62, 0.0  ;;  %996 = vst [vmem:[%s2421_s17 + $0x28] sm:$0xff] %v811_v1  ;;  %1372 = vmatmul.mubr.msk.f32.gmra.mrb[4].mxu1 %vm802_vm4, %v774_v55 }
 0x1e6   : > { %v777_v3 = vmax.f32 %v769_v0, 0.0 }
 0x1e7   : > { %v812_v4 = vsel %vm804_vm6, %v776_v2, 0.0 }
 0x1e8   : > { %v813_v5 = vsel %vm805_vm7, %v777_v3, 0.0  ;;  %1373 = vmatprep.mubr.msk.f32.mxu1 %vm805_vm7, %v777_v3  ;;  %997 = vst [vmem:[%s2421_s17 + $0x30] sm:$0xff] %v812_v4 }
 0x1e9   : > { %998 = vst [vmem:[%s2421_s17 + $0x38] sm:$0xff] %v813_v5  ;;  %1374 = vmatmul.mubr.msk.f32.gmra.mrb[6].mxu1 %vm804_vm6, %v776_v2 }
 0x2b0   : > { %v952_v8 = vpop.f32.mrb[0].mxu1 }
 0x2b1   : > { %v975_v9 = vadd.f32 %v952_v8, %v814_v6  ;;  %v954_v10 = vpop.f32.mrb[1].mxu1 }
 0x2b2   : > { %v976_v12 = vadd.f32 %v954_v10, %v815_v7 }
 0x2b3   : > { %983 = vst [vmem:[%s2419_s29] sm:$0xff] %v975_v9 }
 0x2b4   : > { %984 = vst [vmem:[%s2419_s29 + $0x8] sm:$0xff] %v976_v12  ;;  %v958_v16 = vpop.f32.mrb[2].mxu1 }
 0x2b5   : > { %v977_v17 = vadd.f32 %v958_v16, %v816_v13  ;;  %v960_v18 = vpop.f32.mrb[3].mxu1 }
 0x2b6   : > { %v978_v19 = vadd.f32 %v960_v18, %v817_v15 }
 0x2b7   : > { %985 = vst [vmem:[%s2419_s29 + $0x10] sm:$0xff] %v977_v17 }
 0x2b8   : > { %986 = vst [vmem:[%s2419_s29 + $0x18] sm:$0xff] %v978_v19  ;;  %v964_v22 = vpop.f32.mrb[4].mxu1 }
 0x2b9   : > { %v979_v23 = vadd.f32 %v964_v22, %v818_v20  ;;  %v966_v24 = vpop.f32.mrb[5].mxu1 }
 0x2ba   : > { %v980_v25 = vadd.f32 %v966_v24, %v819_v21  ;;  %1010 = sbr.rel (%p1375_p2) target bundleno = 717 (0x2cd), region = 72  ;;  %v1011_v33 = vld [vmem:[%s2419_s29] sm:$0xff] (!%p1375_p2) }
 0x2bb   : > { %987 = vst [vmem:[%s2419_s29 + $0x20] sm:$0xff] %v979_v23  ;;  %v1012_v34 = vld [vmem:[%s2419_s29 + $0x8] sm:$0xff] (!%p1375_p2)  ;;  %v1021_v44 = vmul.f32 (!%p1375_p2), %v1020_v43, %v1011_v33 }
 0x2bc   : > { %988 = vst [vmem:[%s2419_s29 + $0x28] sm:$0xff] %v980_v25  ;;  %v970_v28 = vpop.f32.mrb[6].mxu1  ;;  %v1022_v45 = vmul.f32 (!%p1375_p2), %v1020_v43, %v1012_v34 }
 0x2bd   : > { %v981_v29 = vadd.f32 %v970_v28, %v820_v26  ;;  %v972_v30 = vpop.f32.mrb[7].mxu1  ;;  %v1041_v14 = vadd.f32 (!%p1375_p2), %v1034_v38, %v1021_v44 }
 0x2be   : > { %v982_v31 = vadd.f32 %v972_v30, %v821_v27  ;;  %v1013_v35 = vld [vmem:[%s2419_s29 + $0x10] sm:$0xff] (!%p1375_p2)  ;;  %v1042_v51 = vadd.f32 (!%p1375_p2), %v1038_v39, %v1022_v45 }
 0x2bf   : > { %989 = vst [vmem:[%s2419_s29 + $0x30] sm:$0xff] %v981_v29  ;;  %v1014_v36 = vld [vmem:[%s2419_s29 + $0x18] sm:$0xff] (!%p1375_p2)  ;;  %v1023_v46 = vmul.f32 (!%p1375_p2), %v1020_v43, %v1013_v35  ;;  %1049 = vst [vmem:[%s2419_s29] sm:$0xff] (!%p1375_p2), %v1041_v14 }
 0x2c0   : > { %990 = vst [vmem:[%s2419_s29 + $0x38] sm:$0xff] %v982_v31  ;;  %v1024_v47 = vmul.f32 (!%p1375_p2), %v1020_v43, %v1014_v36  ;;  %1050 = vst [vmem:[%s2419_s29 + $0x8] sm:$0xff] (!%p1375_p2), %v1042_v51 }
 0x2c1   : > { %v1043_v52 = vadd.f32 %v1034_v38, %v1023_v46 }
 0x2c2   : > { %v1015_v37 = vld [vmem:[%s2419_s29 + $0x20] sm:$0xff]  ;;  %v1044_v53 = vadd.f32 %v1038_v39, %v1024_v47 }
 0x2c3   : > { %v1016_v40 = vld [vmem:[%s2419_s29 + $0x28] sm:$0xff]  ;;  %v1025_v48 = vmul.f32 %v1020_v43, %v1015_v37  ;;  %1051 = vst [vmem:[%s2419_s29 + $0x10] sm:$0xff] %v1043_v52 }
 0x2c4   : > { %v1026_v49 = vmul.f32 %v1020_v43, %v1016_v40  ;;  %1052 = vst [vmem:[%s2419_s29 + $0x18] sm:$0xff] %v1044_v53 }
 0x2c5   : > { %v1045_v54 = vadd.f32 %v1034_v38, %v1025_v48 }
 0x2c6   : > { %v1017_v41 = vld [vmem:[%s2419_s29 + $0x30] sm:$0xff]  ;;  %v1046_v55 = vadd.f32 %v1038_v39, %v1026_v49 }
 0x2c7   : > { %v1018_v42 = vld [vmem:[%s2419_s29 + $0x38] sm:$0xff]  ;;  %v1027_v50 = vmul.f32 %v1020_v43, %v1017_v41  ;;  %1053 = vst [vmem:[%s2419_s29 + $0x20] sm:$0xff] %v1045_v54 }
 0x2c8   : > { %v1028_v11 = vmul.f32 %v1020_v43, %v1018_v42  ;;  %1054 = vst [vmem:[%s2419_s29 + $0x28] sm:$0xff] %v1046_v55 }
 0x2c9   : > { %v1047_v56 = vadd.f32 %v1034_v38, %v1027_v50 }
 0x2ca   : > { %v1048_v57 = vadd.f32 %v1038_v39, %v1028_v11 }
 0x2cb   : > { %1055 = vst [vmem:[%s2419_s29 + $0x30] sm:$0xff] %v1047_v56 }
 0x2cc   : > { %1056 = vst [vmem:[%s2419_s29 + $0x38] sm:$0xff] %v1048_v57 }
 0x2cd PF: > { %s2937_s18 = sld [smem:[#allocation24_spill]]  ;;  %s1101_s11 = sshll.u32 %s2421_s17, 4  ;;  %s2665_s11 = int_to_ptr.vmem [resolvable:$true] %s1101_s11 }
 0x2ce   : > { %s2938_s21 = sld [smem:[#allocation42_spill]]  ;;  %s2940_s23 = sand.u32 1, %s2199_s10  }
 0x2cf   : > { %s2676_s26 = scalar_lea.sflag [#allocation11], %s2940_s23  ;;  %p2941_p11 = scmp.ne.s32.totalorder %s2914_s28, 0 }
 0x2d0   : > { %s1991_s17 = smov [#allocation10]  }
 0x2d1   : > { %s1776_s3 = sshll.u32 %s1991_s17, 4  ;;  %s1777_s3 = int_to_ptr.vmem [resolvable:$false] %s1776_s3 }
 0x2d2   : > { %s1778_s2 = scalar_lea.vmem %s1777_s3, 2048  ;;  %p1779_p1 = scmp.lt.s32.totalorder %s2665_s11, %s1777_s3 }
 0x2d3   : > { %s1399_s30 = sshll.u32 %s2937_s18, 4 }
 0x2d4   : > { %s2661_s20 = sadd.s32 %s1399_s30, %s2399_s15  ;;  %s2939_s12 = smov %s2938_s21 }
 0x2d5   : > { %s1385_s24 = sshll.u32 %s2661_s20, 7  ;;  %s1772_s15 = scalar_lea.vmem %s2665_s11, 1024 }
 0x2d6   : > { %s2672_s25 = scalar_lea.hbm %s2938_s21, %s1385_s24  ;;  %p1773_p12 = scmp.ne.s32.totalorder %s2665_s11, %s1772_s15 }
 0x2d7   : > { %p1780_p0 = scmp.lt.s32.totalorder %s1778_s2, %s1772_s15 }
 0x2d8   : > { %p1774_p10 = pnand %p1773_p12, %p2941_p11 }
 0x2d9   : > { %p1781_p7 = por %p1780_p0, %p1779_p1 }
 0x2da   : > { %p1775_p4 = pneg %p1774_p10 }
 0x2dc   : > { %p1782_p9 = pnand %p1781_p7, %p1775_p4 }
 0x2de   : > { %1785 = shalt.err (!%p1782_p9)
}
 0x2df   : > { %s1786_s10 = scalar_lea.hbm %s2672_s25, 1024  ;;  %s1790_s19 = scalar_lea.hbm %s2939_s12, 4096 }
 0x2e0   : > { %p1787_p8 = scmp.ne.s32.totalorder %s2672_s25, %s1786_s10  ;;  %p1791_p3 = scmp.lt.u32.totalorder %s2672_s25, %s2939_s12 }
 0x2e1   : > { %p1792_p5 = scmp.lt.u32.totalorder %s1790_s19, %s1786_s10  ;;  %p1794_p12 = scmp.lt.u32.totalorder %s1786_s10, %s2672_s25 }
 0x2e2   : > { %p1788_p13 = pnand %p1787_p8, %p2941_p11 }
 0x2e3   : > { %p1793_p2 = por %p1792_p5, %p1791_p3 }
 0x2e4   : > { %p1789_p6 = pneg %p1788_p13 }
 0x2e5   : > { %p1795_p10 = por %p1794_p12, %p1793_p2 }
 0x2e7   : > { %p1796_p4 = pnand %p1795_p10, %p1789_p6 }
 0x2e9   : > { %1799 = shalt.err (!%p1796_p4)
}
 0x2ea   : > { %s1992_s5 = smov 256   ;;  %s1993_s30 = smov 512  }
 0x2eb   : > { %s1994_s14 = smov 16   ;;  %s2942_s23 = sld [smem:[#allocation43_spill]] }
 0x2ec   : > { %1536 = dma.vmem_to_hbm [thread:$0]  (%p2941_p11), %s2665_s11, 1024, %s2672_s25, %s2676_s26, %s1992_s5, %s1993_s30, %s1994_s14  }
 0x2ed   : > { %s1398_s17 = sshll.u32 %s2937_s18, 10  ;;  %s1082_s2 = sshll.u32 %s2419_s29, 4  ;;  %s2717_s2 = int_to_ptr.vmem [resolvable:$true] %s1082_s2 }
 0x2ee   : > { %s2944_s1 = sld [smem:[#allocation41_spill]]  ;;  %s1058_s6 = scalar_lea.sflag [#allocation5], %s2377_s22 }
 0x2ef   : > { %s1800_s11 = scalar_lea.vmem %s2717_s2, 1024  ;;  %p2945_p0 = scmp.ne.s32.totalorder %s2909_s4, 0 }
 0x2f0   : > { %p1801_p1 = scmp.ne.s32.totalorder %s2717_s2, %s1800_s11  ;;  %s1995_s20 = smov [#allocation9]  }
 0x2f1   : > { %s2943_s3 = smov %s2942_s23  ;;  %s2708_s15 = scalar_lea.hbm %s2942_s23, %s1385_s24 }
 0x2f2   : > { %p1802_p7 = pnand %p1801_p1, %p2945_p0  ;;  %s1804_s24 = sshll.u32 %s1995_s20, 4  ;;  %s1805_s24 = int_to_ptr.vmem [resolvable:$false] %s1804_s24 }
 0x2f3   : > { %s1806_s29 = scalar_lea.vmem %s1805_s24, 2048  ;;  %p1807_p8 = scmp.lt.s32.totalorder %s2717_s2, %s1805_s24 }
 0x2f4   : > { %s2715_s19 = scalar_lea.hbm %s2944_s1, %s1398_s17  ;;  %p1803_p9 = pneg %p1802_p7 }
 0x2f5   : > { %p1808_p13 = scmp.lt.s32.totalorder %s1806_s29, %s1800_s11 }
 0x2f7   : > { %p1809_p6 = por %p1808_p13, %p1807_p8 }
 0x2f9   : > { %p1810_p3 = pnand %p1809_p6, %p1803_p9 }
 0x2fb   : > { %1813 = shalt.err (!%p1810_p3)
}
 0x2fc   : > { %s1814_s18 = scalar_lea.hbm %s2715_s19, 1024  ;;  %s1818_s7 = scalar_lea.hbm %s2944_s1, 2048 }
 0x2fd   : > { %p1815_p5 = scmp.ne.s32.totalorder %s2715_s19, %s1814_s18  ;;  %p1819_p10 = scmp.lt.u32.totalorder %s2715_s19, %s2944_s1 }
 0x2fe   : > { %p1820_p4 = scmp.lt.u32.totalorder %s1818_s7, %s1814_s18  ;;  %p1822_p7 = scmp.lt.u32.totalorder %s1814_s18, %s2715_s19 }
 0x2ff   : > { %p1816_p2 = pnand %p1815_p5, %p2945_p0 }
 0x300   : > { %p1821_p1 = por %p1820_p4, %p1819_p10 }
 0x301   : > { %p1817_p12 = pneg %p1816_p2 }
 0x302   : > { %p1823_p9 = por %p1822_p7, %p1821_p1 }
 0x304   : > { %p1824_p8 = pnand %p1823_p9, %p1817_p12 }
 0x306   : > { %1827 = shalt.err (!%p1824_p8)
}
 0x307   : > { %1535 = dma.vmem_to_hbm [thread:$0]  (%p2945_p0), %s2717_s2, 1024, %s2715_s19, %s1058_s6, %s1992_s5, %s1992_s5, %s1994_s14  }
 0x308   : > { %s1120_s17 = sshll.u32 %s2423_s16, 4  ;;  %s1996_s4 = smov [#allocation12]   ;;  %s2747_s17 = int_to_ptr.vmem [resolvable:$true] %s1120_s17 }
 0x309   : > { %s1828_s10 = scalar_lea.vmem %s2747_s17, 1024  ;;  %s1832_s8 = sshll.u32 %s1996_s4, 4  ;;  %s1833_s8 = int_to_ptr.vmem [resolvable:$false] %s1832_s8 }
 0x30a   : > { %p1829_p13 = scmp.ne.s32.totalorder %s2747_s17, %s1828_s10  ;;  %s1834_s22 = scalar_lea.vmem %s1833_s8, 2048 }
 0x30b   : > { %p1835_p5 = scmp.lt.s32.totalorder %s2747_s17, %s1833_s8  ;;  %p1836_p2 = scmp.lt.s32.totalorder %s1834_s22, %s1828_s10 }
 0x30c   : > { %p1830_p6 = pnand %p1829_p13, %p2941_p11 }
 0x30d   : > { %p1837_p12 = por %p1836_p2, %p1835_p5 }
 0x30e   : > { %p1831_p3 = pneg %p1830_p6 }
 0x310   : > { %p1838_p10 = pnand %p1837_p12, %p1831_p3 }
 0x312   : > { %1841 = shalt.err (!%p1838_p10)
}
 0x313   : > { %s1842_s16 = scalar_lea.hbm %s2708_s15, 1024  ;;  %s1846_s6 = scalar_lea.hbm %s2943_s3, 4096 }
 0x314   : > { %p1843_p0 = scmp.ne.s32.totalorder %s2708_s15, %s1842_s16  ;;  %p1847_p7 = scmp.lt.u32.totalorder %s2708_s15, %s2943_s3 }
 0x315   : > { %p1848_p9 = scmp.lt.u32.totalorder %s1846_s6, %s1842_s16  ;;  %p1850_p13 = scmp.lt.u32.totalorder %s1842_s16, %s2708_s15 }
 0x316   : > { %p1844_p4 = pnand %p1843_p0, %p2941_p11 }
 0x317   : > { %p1849_p8 = por %p1848_p9, %p1847_p7 }
 0x318   : > { %p1845_p1 = pneg %p1844_p4 }
 0x319   : > { %p1851_p6 = por %p1850_p13, %p1849_p8 }
 0x31b   : > { %p1852_p3 = pnand %p1851_p6, %p1845_p1 }
 0x31d   : > { %1855 = shalt.err (!%p1852_p3)
}
 0x31e   : > { %1537 = dma.vmem_to_hbm [thread:$0]  (%p2941_p11), %s2747_s17, 1024, %s2708_s15, %s2676_s26, %s1992_s5, %s1993_s30, %s1994_s14  }
 0x31f PF: > { %s2946_s24 = sld [smem:[#allocation32_spill]]  ;;  %p1562_p5 = scmp.ge.s32.totalorder %s1982_s27, 2 }
 0x320   : > { %s1135_s29 = sand.u32 1, %s1954_s0  }
 0x321   : > { %s1136_s18 = scalar_lea.sflag [#allocation5], %s1135_s29 }
 0x325   : > { %p2947_p2 = scmp.ne.s32.totalorder %s2946_s24, 0 }
 0x327   : > { %p1552_p12 = pnand %p1562_p5, %p2947_p2 }
 0x329   : > { %1921 = dma.done.wait (!%p1552_p12), %s1136_s18, 1024  }
 0x32a   : > { %1923 = vsyncadd (!%p1552_p12), %s1136_s18, 4294966272  ;;  %s2948_s28 = sadd.s32 4294967294, %s1982_s27   ;;  %p2949_p10 = scmp.ne.s32.totalorder %s2915_s9, 0 }
 0x32b   : > { %s1144_s25 = sand.u32 1, %s2948_s28  }
 0x32c   : > { %p1555_p0 = pnand %p1562_p5, %p2949_p10  ;;  %s1145_s13 = scalar_lea.sflag [#allocation11], %s1144_s25 }
 0x32e   : > { %1925 = dma.done.wait (!%p1555_p0), %s1145_s13, 2048  }
 0x32f   : > { %1927 = vsyncadd (!%p1555_p0), %s1145_s13, 4294965248  ;;  %s34_s27 = sadd.s32 1, %s1982_s27   ;;  %s2951_s15 = sld [smem:[#allocation17_spill]] }
 0x330   : > { %p2783_p11 = scmp.ge.s32.totalorder %s34_s27, 6   ;;  %s2952_s16 = sld [smem:[#allocation18_spill]] }
 0x331   : > { %s2953_s17 = sld [smem:[#allocation33_spill]]  ;;  %s2954_s18 = sld [smem:[#allocation19_spill]] }
 0x332   : > { %s2955_s19 = sld [smem:[#allocation20_spill]]  ;;  %s2956_s20 = sld [smem:[#allocation30_spill]] }
 0x333   : > { %s2957_s0 = sld [smem:[#allocation21_spill]]  ;;  %s2958_s21 = sld [smem:[#allocation22_spill]] }
 0x334   : > { %s2959_s22 = sld [smem:[#allocation31_spill]]  ;;  %s2960_s23 = sld [smem:[#allocation25_spill]] }
 0x335   : > { %s2961_s24 = sld [smem:[#allocation26_spill]]  ;;  %s2962_s25 = sld [smem:[#allocation27_spill]] }
 0x336   : > { %s2963_s9 = sld [smem:[#allocation28_spill]]  ;;  %33 = sbr.rel (!%p2783_p11) target bundleno = 26 (0x1a), region = 170 }
 0x33c   : > { %s2965_s26 = smov %s2963_s9 }
 0x33d   :  { %1159 = vsyncpa [#allocation4], 1 }
 0x33e   :  { %1161 = vsyncpa [#allocation4 + $0x1], 1 }
 0x33f   :  { %1162 = vsyncpa [#allocation7], 1 }
 0x340   :  { %1164 = vsyncpa [#allocation7 + $0x1], 1 }
 0x341   :  { %1165 = vsyncpa [#allocation5], 1 }
 0x342   :  { %1167 = vsyncpa [#allocation5 + $0x1], 1 }
 0x343   :  { %1168 = vsyncpa [#allocation11], 1 }
 0x344   :  { %1170 = vsyncpa [#allocation11 + $0x1], 1 }

</bundles_post_ra>
